<compile_context>
chip_gen: v7x
topology: tpu7x:2x2x1
jax: 0.10.0
libtpu: 0.0.40
codegen_flags: <defaults>
</compile_context>

<pallas_src>
import functools

import jax
import jax.numpy as jnp
import numpy as np
from jax.experimental import pallas as pl
from jax.experimental.pallas import tpu as pltpu

EPS = 1e-5
_PAR = ((0, 0), (0, 1), (1, 0), (1, 1))   # enumeration order for (py,px) / (dy,dx)


def _round_up(v, m):
    return (v + m - 1) // m * m


def _choose_tile(mprime, cin_pad, cout, smax, budget_bytes=20 * 1024 * 1024):
    """Largest lane tile (multiple of 128) whose double-buffered blocks fit the
    VMEM budget, then shrunk to the smallest 128-multiple that still covers
    mprime with the same tile count (minimizes pad waste)."""
    def step_bytes(tm):
        x_blk = cin_pad * (tm + smax) * 2        # bf16 input tile (+halo)
        conv_blk = 4 * cout * tm * 2             # bf16 conv output block
        mask_blk = tm * 4                        # f32 validity mask
        stats_blk = 2 * 4 * cout * 4             # psum/psq blocks
        acc_tmp = 4 * cout * tm * 4              # f32 accumulator headroom
        return 2 * (x_blk + conv_blk + mask_blk + stats_blk) + acc_tmp

    tm = 4096
    while tm > 128 and step_bytes(tm) > budget_bytes:
        tm -= 128
    tm = min(max(tm, 128), _round_up(mprime, 128))
    n_mt = -(-mprime // tm)
    tm = _round_up(-(-mprime // n_mt), 128)
    return tm, n_mt


def _conv_stats_kernel(x_ref, w_ref, mask_ref, conv_ref, psum_ref, psq_ref,
                       *, tm, wp):
    # x_ref:    (Cin_pad, tm + Smax) bf16  flattened padded-coord x tile (+halo)
    # w_ref:    (16, Cout, Cin_pad)  bf16  per-(parity, tap) 1x1 weights
    # mask_ref: (1, tm)              f32   1.0 at valid (non-pad) positions
    # conv_ref: (4, Cout, tm)        bf16  per-parity conv output (lane-dense)
    # psum/psq: (4, Cout, 1)         f32   masked BN partial sums (f32 acc)
    mask = mask_ref[...]
    for pi, (py, px) in enumerate(_PAR):
        acc = None
        for ti, (dy, dx) in enumerate(_PAR):
            s = (py + dy) * wp + (px + dx)       # static lane shift (in-VMEM slice)
            part = jnp.dot(w_ref[pi * 4 + ti], x_ref[:, s:s + tm],
                           preferred_element_type=jnp.float32)
            acc = part if acc is None else acc + part
        conv_ref[pi] = acc.astype(conv_ref.dtype)
        am = acc * mask                           # exclude pad-ring / tail columns
        psum_ref[pi] = jnp.sum(am, axis=-1, keepdims=True)
        psq_ref[pi] = jnp.sum(am * acc, axis=-1, keepdims=True)


def uup_forward(x, skip, weight, gamma, beta, *, kernel=4, padding=1, stride=2):
    assert kernel == 4 and padding == 1 and stride == 2
    N, Cin, H, W = x.shape
    Cout = weight.shape[1]
    OH, OW = stride * H, stride * W
    Hp, Wp = H + 2, W + 2                 # padded spatial extents
    Mprime = N * Hp * Wp                  # per-parity pixels incl. the pad ring
    M_total = N * OH * OW                 # true BN element count (= 4*N*H*W)
    Smax = 2 * Wp + 2                     # largest (parity, tap) lane shift
    Cin_pad = _round_up(Cin, 8)           # sublane-align the contraction dim

    tm, n_mt = _choose_tile(Mprime, Cin_pad, Cout, Smax)
    Mtot = n_mt * tm

    # ---- cheap XLA prep (~0.6x of x, vs the old 8x im2col patch tensor) ----
    xp = jnp.pad(x, ((0, 0), (0, Cin_pad - Cin), (1, 1), (1, 1)))
    xflat = jnp.transpose(xp, (1, 0, 2, 3)).reshape(Cin_pad, Mprime)
    xflat = jnp.pad(xflat, ((0, 0), (0, Mtot + Smax - Mprime))).astype(jnp.bfloat16)
    # Overlapping tiles carry their own +Smax halo so every tap is a static
    # in-tile lane slice (no in-kernel reshape, no BlockSpec halo tricks).
    xtiles = jnp.stack([xflat[:, i * tm:i * tm + tm + Smax] for i in range(n_mt)],
                       axis=0)                                   # (n_mt, Cin_pad, tm+Smax)

    # Per-(parity, tap) 1x1 weight matrices (Cout, Cin_pad), bf16.
    ktap = {0: (3, 1), 1: (2, 0)}         # parity -> kernel tap for window offset 0,1
    wmats = []
    for py, px in _PAR:
        for dy, dx in _PAR:
            wmats.append(jnp.transpose(weight[:, :, ktap[py][dy], ktap[px][dx]],
                                       (1, 0)))                  # (Cout, Cin)
    w_all = jnp.stack(wmats, axis=0)
    w_all = jnp.pad(w_all, ((0, 0), (0, 0), (0, Cin_pad - Cin))).astype(jnp.bfloat16)

    # Validity mask over padded-coordinate lanes: pad-ring / tail positions are
    # excluded from the BN stats and never read back in the epilogue.
    mm = jnp.arange(Mtot, dtype=jnp.int32)
    valid = (mm % Wp < W) & ((mm // Wp) % Hp < H) & (mm < Mprime)
    mask = valid.astype(jnp.float32)[None, :]                    # (1, Mtot)

    cparams = pltpu.CompilerParams(
        dimension_semantics=("parallel",),       # megacore can split the M tiles
        vmem_limit_bytes=48 * 1024 * 1024)       # <= v7x 64 MiB; roomy on v5e/v6e

    kern = functools.partial(_conv_stats_kernel, tm=tm, wp=Wp)
    conv, psum, psq = pl.pallas_call(
        kern,
        out_shape=(jax.ShapeDtypeStruct((4, Cout, Mtot), jnp.bfloat16),
                   jax.ShapeDtypeStruct((n_mt, 4, Cout, 1), jnp.float32),
                   jax.ShapeDtypeStruct((n_mt, 4, Cout, 1), jnp.float32)),
        grid=(n_mt,),
        in_specs=[
            pl.BlockSpec((None, Cin_pad, tm + Smax), lambda mi: (mi, 0, 0)),
            pl.BlockSpec((16, Cout, Cin_pad), lambda mi: (0, 0, 0)),
            pl.BlockSpec((1, tm), lambda mi: (0, mi)),
        ],
        out_specs=(
            pl.BlockSpec((4, Cout, tm), lambda mi: (0, 0, mi)),
            pl.BlockSpec((None, 4, Cout, 1), lambda mi: (mi, 0, 0, 0)),
            pl.BlockSpec((None, 4, Cout, 1), lambda mi: (mi, 0, 0, 0)),
        ),
        compiler_params=cparams,
    )(xtiles, w_all, mask)

    # ---- O(Cout) BN stat finalize (f32) ----
    # TODO(synk): E[x^2]-mean^2 in f32 can cancel for huge M / large means;
    # switch to a per-tile mean-shifted (Chan) combine if that ever bites.
    s = jnp.sum(psum, axis=(0, 1))[:, 0]
    sq = jnp.sum(psq, axis=(0, 1))[:, 0]
    mean = s / M_total
    var = jnp.maximum(sq / M_total - mean * mean, 0.0)
    scale = (gamma * jax.lax.rsqrt(var + EPS)).astype(jnp.float32)
    shift = (beta - mean * scale).astype(jnp.float32)

    # ---- fused XLA epilogue: BN affine + ReLU + pixel-shuffle + concat ----
    # One read of the bf16 conv, one write of the output half; the stride-2
    # parity interleave is not expressible as a BlockSpec block placement, so it
    # stays in XLA per the perf review.
    convv = conv[:, :, :Mprime].reshape(4, Cout, N, Hp, Wp)[:, :, :, :H, :W]
    y = (convv.astype(jnp.float32) * scale[None, :, None, None, None]
         + shift[None, :, None, None, None])
    y = jnp.maximum(y, 0.0)
    y = y.reshape(2, 2, Cout, N, H, W)                 # (py, px, co, n, h, w)
    y = jnp.transpose(y, (3, 2, 4, 0, 5, 1)).reshape(N, Cout, OH, OW)
    # TODO(synk): fuse the concat by packing px-pairs (2xbf16 -> u32) in-kernel
    # and writing straight into a channel-offset slice of the final buffer.
    return jnp.concatenate([y, skip], axis=1)          # torch.cat(dim=1)


# ---------------- pure-JAX reference (self-check) ----------------

def uup_reference(x, skip, weight, gamma, beta):
    w_oihw = jnp.transpose(weight, (1, 0, 2, 3))[:, :, ::-1, ::-1]
    conv = jax.lax.conv_general_dilated(
        x, w_oihw, window_strides=(1, 1), padding=((2, 2), (2, 2)),
        lhs_dilation=(2, 2), dimension_numbers=('NCHW', 'OIHW', 'NCHW'),
        precision=jax.lax.Precision.HIGHEST)
    mean = conv.mean(axis=(0, 2, 3), keepdims=True)
    var = jnp.square(conv - mean).mean(axis=(0, 2, 3), keepdims=True)
    y = (conv - mean) * jax.lax.rsqrt(var + EPS)
    y = y * gamma.reshape(1, -1, 1, 1) + beta.reshape(1, -1, 1, 1)
    y = jnp.maximum(y, 0.0)
    return jnp.concatenate([y, skip], axis=1)


if __name__ == "__main__":
    key = jax.random.PRNGKey(0)
    k_x, k_s, k_w, k_g, k_b = jax.random.split(key, 5)

    N, Cin, H, W = 2, 4, 16, 16
    Cout = 8                      # out_size
    OH, OW = 2 * H, 2 * W         # stride-2 transposed conv doubles spatial dims
    Cskip = 8                     # skip_input channels

    x = jax.random.normal(k_x, (N, Cin, H, W), jnp.float32)
    skip = jax.random.normal(k_s, (N, Cskip, OH, OW), jnp.float32)
    weight = 0.1 * jax.random.normal(k_w, (Cin, Cout, 4, 4), jnp.float32)
    gamma = 1.0 + 0.1 * jax.random.normal(k_g, (Cout,), jnp.float32)
    beta = 0.1 * jax.random.normal(k_b, (Cout,), jnp.float32)

    fwd = jax.jit(uup_forward)
    out = jax.block_until_ready(fwd(x, skip, weight, gamma, beta))

    ref = jax.block_until_ready(uup_reference(x, skip, weight, gamma, beta))
    assert out.shape == (N, Cout + Cskip, OH, OW), out.shape
    # bf16 MXU inputs + bf16-stored conv intermediate (per perf review) vs the
    # f32-HIGHEST reference -> slightly loosened tolerance.
    np.testing.assert_allclose(np.asarray(out), np.asarray(ref),
                               rtol=3e-2, atol=3e-2)
    print("KERNEL_OK")
</pallas_src>

<mosaic_0001>
module attributes {stable_mosaic.version = 11 : i64} {
  func.func @_conv_stats_kernel(%arg0: i32, %arg1: memref<1x8x806xbf16, #tpu.memory_space<vmem>>, %arg2: memref<16x8x8xbf16, #tpu.memory_space<vmem>>, %arg3: memref<1x768xf32, #tpu.memory_space<vmem>>, %arg4: memref<4x8x768xbf16, #tpu.memory_space<vmem>>, %arg5: memref<1x4x8x1xf32, #tpu.memory_space<vmem>>, %arg6: memref<1x4x8x1xf32, #tpu.memory_space<vmem>>) attributes {dimension_semantics = [#tpu.dimension_semantics<parallel>], iteration_bounds = array<i64: 1>, scalar_prefetch = 0 : i64, scratch_operands = 0 : i64, tpu.core_type = #tpu.core_type<tc>, window_params = [{transform_indices = @transform_0, window_bounds = array<i64: 1, 8, 806>}, {pipeline_mode = #tpu.pipeline_mode<synchronous>, transform_indices = @transform_1, window_bounds = array<i64: 16, 8, 8>}, {transform_indices = @transform_2, window_bounds = array<i64: 1, 768>}, {transform_indices = @transform_3, window_bounds = array<i64: 4, 8, 768>}, {transform_indices = @transform_4, window_bounds = array<i64: 1, 4, 8, 1>}, {transform_indices = @transform_5, window_bounds = array<i64: 1, 4, 8, 1>}]} {
    %c0 = arith.constant 0 : index
    %c0_0 = arith.constant 0 : index
    %0 = vector.load %arg3[%c0, %c0_0] : memref<1x768xf32, #tpu.memory_space<vmem>>, vector<1x768xf32>
    %c0_1 = arith.constant 0 : index
    %c0_2 = arith.constant 0 : index
    %c0_3 = arith.constant 0 : index
    %1 = vector.load %arg2[%c0_1, %c0_2, %c0_3] : memref<16x8x8xbf16, #tpu.memory_space<vmem>>, vector<1x8x8xbf16>
    %2 = vector.shape_cast %1 : vector<1x8x8xbf16> to vector<8x8xbf16>
    %c0_4 = arith.constant 0 : index
    %c0_5 = arith.constant 0 : index
    %c0_6 = arith.constant 0 : index
    %3 = vector.load %arg1[%c0_4, %c0_5, %c0_6] : memref<1x8x806xbf16, #tpu.memory_space<vmem>>, vector<1x8x768xbf16>
    %4 = vector.shape_cast %3 : vector<1x8x768xbf16> to vector<8x768xbf16>
    %cst = arith.constant dense<0.000000e+00> : vector<8x768xf32>
    %5 = tpu.matmul %2, %4, %cst {dimension_numbers = #tpu.dot_dimension_numbers<[1], [0], [0], [1], [0, 0, 1, 1], [], []>} : vector<8x8xbf16>, vector<8x768xbf16>, vector<8x768xf32> -> vector<8x768xf32>
    %c1 = arith.constant 1 : index
    %c0_7 = arith.constant 0 : index
    %c0_8 = arith.constant 0 : index
    %6 = vector.load %arg2[%c1, %c0_7, %c0_8] : memref<16x8x8xbf16, #tpu.memory_space<vmem>>, vector<1x8x8xbf16>
    %7 = vector.shape_cast %6 : vector<1x8x8xbf16> to vector<8x8xbf16>
    %c0_9 = arith.constant 0 : index
    %c0_10 = arith.constant 0 : index
    %c1_11 = arith.constant 1 : index
    %8 = vector.load %arg1[%c0_9, %c0_10, %c1_11] : memref<1x8x806xbf16, #tpu.memory_space<vmem>>, vector<1x8x768xbf16>
    %9 = vector.shape_cast %8 : vector<1x8x768xbf16> to vector<8x768xbf16>
    %cst_12 = arith.constant dense<0.000000e+00> : vector<8x768xf32>
    %10 = tpu.matmul %7, %9, %cst_12 {dimension_numbers = #tpu.dot_dimension_numbers<[1], [0], [0], [1], [0, 0, 1, 1], [], []>} : vector<8x8xbf16>, vector<8x768xbf16>, vector<8x768xf32> -> vector<8x768xf32>
    %11 = arith.addf %5, %10 : vector<8x768xf32>
    %c2 = arith.constant 2 : index
    %c0_13 = arith.constant 0 : index
    %c0_14 = arith.constant 0 : index
    %12 = vector.load %arg2[%c2, %c0_13, %c0_14] : memref<16x8x8xbf16, #tpu.memory_space<vmem>>, vector<1x8x8xbf16>
    %13 = vector.shape_cast %12 : vector<1x8x8xbf16> to vector<8x8xbf16>
    %c0_15 = arith.constant 0 : index
    %c0_16 = arith.constant 0 : index
    %c18 = arith.constant 18 : index
    %14 = vector.load %arg1[%c0_15, %c0_16, %c18] : memref<1x8x806xbf16, #tpu.memory_space<vmem>>, vector<1x8x768xbf16>
    %15 = vector.shape_cast %14 : vector<1x8x768xbf16> to vector<8x768xbf16>
    %cst_17 = arith.constant dense<0.000000e+00> : vector<8x768xf32>
    %16 = tpu.matmul %13, %15, %cst_17 {dimension_numbers = #tpu.dot_dimension_numbers<[1], [0], [0], [1], [0, 0, 1, 1], [], []>} : vector<8x8xbf16>, vector<8x768xbf16>, vector<8x768xf32> -> vector<8x768xf32>
    %17 = arith.addf %11, %16 : vector<8x768xf32>
    %c3 = arith.constant 3 : index
    %c0_18 = arith.constant 0 : index
    %c0_19 = arith.constant 0 : index
    %18 = vector.load %arg2[%c3, %c0_18, %c0_19] : memref<16x8x8xbf16, #tpu.memory_space<vmem>>, vector<1x8x8xbf16>
    %19 = vector.shape_cast %18 : vector<1x8x8xbf16> to vector<8x8xbf16>
    %c0_20 = arith.constant 0 : index
    %c0_21 = arith.constant 0 : index
    %c19 = arith.constant 19 : index
    %20 = vector.load %arg1[%c0_20, %c0_21, %c19] : memref<1x8x806xbf16, #tpu.memory_space<vmem>>, vector<1x8x768xbf16>
    %21 = vector.shape_cast %20 : vector<1x8x768xbf16> to vector<8x768xbf16>
    %cst_22 = arith.constant dense<0.000000e+00> : vector<8x768xf32>
    %22 = tpu.matmul %19, %21, %cst_22 {dimension_numbers = #tpu.dot_dimension_numbers<[1], [0], [0], [1], [0, 0, 1, 1], [], []>} : vector<8x8xbf16>, vector<8x768xbf16>, vector<8x768xf32> -> vector<8x768xf32>
    %23 = arith.addf %17, %22 : vector<8x768xf32>
    %24 = arith.truncf %23 : vector<8x768xf32> to vector<8x768xbf16>
    %c0_23 = arith.constant 0 : index
    %c0_24 = arith.constant 0 : index
    %c0_25 = arith.constant 0 : index
    %25 = vector.load %arg4[%c0_23, %c0_24, %c0_25] : memref<4x8x768xbf16, #tpu.memory_space<vmem>>, vector<1x8x768xbf16>
    %26 = vector.shape_cast %25 : vector<1x8x768xbf16> to vector<8x768xbf16>
    %27 = vector.shape_cast %24 : vector<8x768xbf16> to vector<1x8x768xbf16>
    tpu.vector_store %arg4[%c0_23, %c0_24, %c0_25], %27 {strides = array<i32>} : memref<4x8x768xbf16, #tpu.memory_space<vmem>>, vector<1x8x768xbf16>,
    %28 = vector.broadcast %0 : vector<1x768xf32> to vector<8x768xf32>
    %29 = arith.mulf %23, %28 : vector<8x768xf32>
    %cst_26 = arith.constant dense<0.000000e+00> : vector<8xf32>
    %30 = vector.multi_reduction <add>, %29, %cst_26 [1] : vector<8x768xf32> to vector<8xf32>
    %31 = vector.shape_cast %30 : vector<8xf32> to vector<8x1xf32>
    %c0_27 = arith.constant 0 : index
    %c0_28 = arith.constant 0 : index
    %c0_29 = arith.constant 0 : index
    %c0_30 = arith.constant 0 : index
    %32 = vector.load %arg5[%c0_27, %c0_28, %c0_29, %c0_30] : memref<1x4x8x1xf32, #tpu.memory_space<vmem>>, vector<1x1x8x1xf32>
    %33 = vector.shape_cast %32 : vector<1x1x8x1xf32> to vector<8x1xf32>
    %34 = vector.shape_cast %31 : vector<8x1xf32> to vector<1x1x8x1xf32>
    tpu.vector_store %arg5[%c0_27, %c0_28, %c0_29, %c0_30], %34 {strides = array<i32>} : memref<1x4x8x1xf32, #tpu.memory_space<vmem>>, vector<1x1x8x1xf32>,
    %35 = arith.mulf %29, %23 : vector<8x768xf32>
    %cst_31 = arith.constant dense<0.000000e+00> : vector<8xf32>
    %36 = vector.multi_reduction <add>, %35, %cst_31 [1] : vector<8x768xf32> to vector<8xf32>
    %37 = vector.shape_cast %36 : vector<8xf32> to vector<8x1xf32>
    %c0_32 = arith.constant 0 : index
    %c0_33 = arith.constant 0 : index
    %c0_34 = arith.constant 0 : index
    %c0_35 = arith.constant 0 : index
    %38 = vector.load %arg6[%c0_32, %c0_33, %c0_34, %c0_35] : memref<1x4x8x1xf32, #tpu.memory_space<vmem>>, vector<1x1x8x1xf32>
    %39 = vector.shape_cast %38 : vector<1x1x8x1xf32> to vector<8x1xf32>
    %40 = vector.shape_cast %37 : vector<8x1xf32> to vector<1x1x8x1xf32>
    tpu.vector_store %arg6[%c0_32, %c0_33, %c0_34, %c0_35], %40 {strides = array<i32>} : memref<1x4x8x1xf32, #tpu.memory_space<vmem>>, vector<1x1x8x1xf32>,
    %c4 = arith.constant 4 : index
    %c0_36 = arith.constant 0 : index
    %c0_37 = arith.constant 0 : index
    %41 = vector.load %arg2[%c4, %c0_36, %c0_37] : memref<16x8x8xbf16, #tpu.memory_space<vmem>>, vector<1x8x8xbf16>
    %42 = vector.shape_cast %41 : vector<1x8x8xbf16> to vector<8x8xbf16>
    %c0_38 = arith.constant 0 : index
    %c0_39 = arith.constant 0 : index
    %c1_40 = arith.constant 1 : index
    %43 = vector.load %arg1[%c0_38, %c0_39, %c1_40] : memref<1x8x806xbf16, #tpu.memory_space<vmem>>, vector<1x8x768xbf16>
    %44 = vector.shape_cast %43 : vector<1x8x768xbf16> to vector<8x768xbf16>
    %cst_41 = arith.constant dense<0.000000e+00> : vector<8x768xf32>
    %45 = tpu.matmul %42, %44, %cst_41 {dimension_numbers = #tpu.dot_dimension_numbers<[1], [0], [0], [1], [0, 0, 1, 1], [], []>} : vector<8x8xbf16>, vector<8x768xbf16>, vector<8x768xf32> -> vector<8x768xf32>
    %c5 = arith.constant 5 : index
    %c0_42 = arith.constant 0 : index
    %c0_43 = arith.constant 0 : index
    %46 = vector.load %arg2[%c5, %c0_42, %c0_43] : memref<16x8x8xbf16, #tpu.memory_space<vmem>>, vector<1x8x8xbf16>
    %47 = vector.shape_cast %46 : vector<1x8x8xbf16> to vector<8x8xbf16>
    %c0_44 = arith.constant 0 : index
    %c0_45 = arith.constant 0 : index
    %c2_46 = arith.constant 2 : index
    %48 = vector.load %arg1[%c0_44, %c0_45, %c2_46] : memref<1x8x806xbf16, #tpu.memory_space<vmem>>, vector<1x8x768xbf16>
    %49 = vector.shape_cast %48 : vector<1x8x768xbf16> to vector<8x768xbf16>
    %cst_47 = arith.constant dense<0.000000e+00> : vector<8x768xf32>
    %50 = tpu.matmul %47, %49, %cst_47 {dimension_numbers = #tpu.dot_dimension_numbers<[1], [0], [0], [1], [0, 0, 1, 1], [], []>} : vector<8x8xbf16>, vector<8x768xbf16>, vector<8x768xf32> -> vector<8x768xf32>
    %51 = arith.addf %45, %50 : vector<8x768xf32>
    %c6 = arith.constant 6 : index
    %c0_48 = arith.constant 0 : index
    %c0_49 = arith.constant 0 : index
    %52 = vector.load %arg2[%c6, %c0_48, %c0_49] : memref<16x8x8xbf16, #tpu.memory_space<vmem>>, vector<1x8x8xbf16>
    %53 = vector.shape_cast %52 : vector<1x8x8xbf16> to vector<8x8xbf16>
    %c0_50 = arith.constant 0 : index
    %c0_51 = arith.constant 0 : index
    %c19_52 = arith.constant 19 : index
    %54 = vector.load %arg1[%c0_50, %c0_51, %c19_52] : memref<1x8x806xbf16, #tpu.memory_space<vmem>>, vector<1x8x768xbf16>
    %55 = vector.shape_cast %54 : vector<1x8x768xbf16> to vector<8x768xbf16>
    %cst_53 = arith.constant dense<0.000000e+00> : vector<8x768xf32>
    %56 = tpu.matmul %53, %55, %cst_53 {dimension_numbers = #tpu.dot_dimension_numbers<[1], [0], [0], [1], [0, 0, 1, 1], [], []>} : vector<8x8xbf16>, vector<8x768xbf16>, vector<8x768xf32> -> vector<8x768xf32>
    %57 = arith.addf %51, %56 : vector<8x768xf32>
    %c7 = arith.constant 7 : index
    %c0_54 = arith.constant 0 : index
    %c0_55 = arith.constant 0 : index
    %58 = vector.load %arg2[%c7, %c0_54, %c0_55] : memref<16x8x8xbf16, #tpu.memory_space<vmem>>, vector<1x8x8xbf16>
    %59 = vector.shape_cast %58 : vector<1x8x8xbf16> to vector<8x8xbf16>
    %c0_56 = arith.constant 0 : index
    %c0_57 = arith.constant 0 : index
    %c20 = arith.constant 20 : index
    %60 = vector.load %arg1[%c0_56, %c0_57, %c20] : memref<1x8x806xbf16, #tpu.memory_space<vmem>>, vector<1x8x768xbf16>
    %61 = vector.shape_cast %60 : vector<1x8x768xbf16> to vector<8x768xbf16>
    %cst_58 = arith.constant dense<0.000000e+00> : vector<8x768xf32>
    %62 = tpu.matmul %59, %61, %cst_58 {dimension_numbers = #tpu.dot_dimension_numbers<[1], [0], [0], [1], [0, 0, 1, 1], [], []>} : vector<8x8xbf16>, vector<8x768xbf16>, vector<8x768xf32> -> vector<8x768xf32>
    %63 = arith.addf %57, %62 : vector<8x768xf32>
    %64 = arith.truncf %63 : vector<8x768xf32> to vector<8x768xbf16>
    %c1_59 = arith.constant 1 : index
    %c0_60 = arith.constant 0 : index
    %c0_61 = arith.constant 0 : index
    %65 = vector.load %arg4[%c1_59, %c0_60, %c0_61] : memref<4x8x768xbf16, #tpu.memory_space<vmem>>, vector<1x8x768xbf16>
    %66 = vector.shape_cast %65 : vector<1x8x768xbf16> to vector<8x768xbf16>
    %67 = vector.shape_cast %64 : vector<8x768xbf16> to vector<1x8x768xbf16>
    tpu.vector_store %arg4[%c1_59, %c0_60, %c0_61], %67 {strides = array<i32>} : memref<4x8x768xbf16, #tpu.memory_space<vmem>>, vector<1x8x768xbf16>,
    %68 = vector.broadcast %0 : vector<1x768xf32> to vector<8x768xf32>
    %69 = arith.mulf %63, %68 : vector<8x768xf32>
    %cst_62 = arith.constant dense<0.000000e+00> : vector<8xf32>
    %70 = vector.multi_reduction <add>, %69, %cst_62 [1] : vector<8x768xf32> to vector<8xf32>
    %71 = vector.shape_cast %70 : vector<8xf32> to vector<8x1xf32>
    %c0_63 = arith.constant 0 : index
    %c1_64 = arith.constant 1 : index
    %c0_65 = arith.constant 0 : index
    %c0_66 = arith.constant 0 : index
    %72 = vector.load %arg5[%c0_63, %c1_64, %c0_65, %c0_66] : memref<1x4x8x1xf32, #tpu.memory_space<vmem>>, vector<1x1x8x1xf32>
    %73 = vector.shape_cast %72 : vector<1x1x8x1xf32> to vector<8x1xf32>
    %74 = vector.shape_cast %71 : vector<8x1xf32> to vector<1x1x8x1xf32>
    tpu.vector_store %arg5[%c0_63, %c1_64, %c0_65, %c0_66], %74 {strides = array<i32>} : memref<1x4x8x1xf32, #tpu.memory_space<vmem>>, vector<1x1x8x1xf32>,
    %75 = arith.mulf %69, %63 : vector<8x768xf32>
    %cst_67 = arith.constant dense<0.000000e+00> : vector<8xf32>
    %76 = vector.multi_reduction <add>, %75, %cst_67 [1] : vector<8x768xf32> to vector<8xf32>
    %77 = vector.shape_cast %76 : vector<8xf32> to vector<8x1xf32>
    %c0_68 = arith.constant 0 : index
    %c1_69 = arith.constant 1 : index
    %c0_70 = arith.constant 0 : index
    %c0_71 = arith.constant 0 : index
    %78 = vector.load %arg6[%c0_68, %c1_69, %c0_70, %c0_71] : memref<1x4x8x1xf32, #tpu.memory_space<vmem>>, vector<1x1x8x1xf32>
    %79 = vector.shape_cast %78 : vector<1x1x8x1xf32> to vector<8x1xf32>
    %80 = vector.shape_cast %77 : vector<8x1xf32> to vector<1x1x8x1xf32>
    tpu.vector_store %arg6[%c0_68, %c1_69, %c0_70, %c0_71], %80 {strides = array<i32>} : memref<1x4x8x1xf32, #tpu.memory_space<vmem>>, vector<1x1x8x1xf32>,
    %c8 = arith.constant 8 : index
    %c0_72 = arith.constant 0 : index
    %c0_73 = arith.constant 0 : index
    %81 = vector.load %arg2[%c8, %c0_72, %c0_73] : memref<16x8x8xbf16, #tpu.memory_space<vmem>>, vector<1x8x8xbf16>
    %82 = vector.shape_cast %81 : vector<1x8x8xbf16> to vector<8x8xbf16>
    %c0_74 = arith.constant 0 : index
    %c0_75 = arith.constant 0 : index
    %c18_76 = arith.constant 18 : index
    %83 = vector.load %arg1[%c0_74, %c0_75, %c18_76] : memref<1x8x806xbf16, #tpu.memory_space<vmem>>, vector<1x8x768xbf16>
    %84 = vector.shape_cast %83 : vector<1x8x768xbf16> to vector<8x768xbf16>
    %cst_77 = arith.constant dense<0.000000e+00> : vector<8x768xf32>
    %85 = tpu.matmul %82, %84, %cst_77 {dimension_numbers = #tpu.dot_dimension_numbers<[1], [0], [0], [1], [0, 0, 1, 1], [], []>} : vector<8x8xbf16>, vector<8x768xbf16>, vector<8x768xf32> -> vector<8x768xf32>
    %c9 = arith.constant 9 : index
    %c0_78 = arith.constant 0 : index
    %c0_79 = arith.constant 0 : index
    %86 = vector.load %arg2[%c9, %c0_78, %c0_79] : memref<16x8x8xbf16, #tpu.memory_space<vmem>>, vector<1x8x8xbf16>
    %87 = vector.shape_cast %86 : vector<1x8x8xbf16> to vector<8x8xbf16>
    %c0_80 = arith.constant 0 : index
    %c0_81 = arith.constant 0 : index
    %c19_82 = arith.constant 19 : index
    %88 = vector.load %arg1[%c0_80, %c0_81, %c19_82] : memref<1x8x806xbf16, #tpu.memory_space<vmem>>, vector<1x8x768xbf16>
    %89 = vector.shape_cast %88 : vector<1x8x768xbf16> to vector<8x768xbf16>
    %cst_83 = arith.constant dense<0.000000e+00> : vector<8x768xf32>
    %90 = tpu.matmul %87, %89, %cst_83 {dimension_numbers = #tpu.dot_dimension_numbers<[1], [0], [0], [1], [0, 0, 1, 1], [], []>} : vector<8x8xbf16>, vector<8x768xbf16>, vector<8x768xf32> -> vector<8x768xf32>
    %91 = arith.addf %85, %90 : vector<8x768xf32>
    %c10 = arith.constant 10 : index
    %c0_84 = arith.constant 0 : index
    %c0_85 = arith.constant 0 : index
    %92 = vector.load %arg2[%c10, %c0_84, %c0_85] : memref<16x8x8xbf16, #tpu.memory_space<vmem>>, vector<1x8x8xbf16>
    %93 = vector.shape_cast %92 : vector<1x8x8xbf16> to vector<8x8xbf16>
    %c0_86 = arith.constant 0 : index
    %c0_87 = arith.constant 0 : index
    %c36 = arith.constant 36 : index
    %94 = vector.load %arg1[%c0_86, %c0_87, %c36] : memref<1x8x806xbf16, #tpu.memory_space<vmem>>, vector<1x8x768xbf16>
    %95 = vector.shape_cast %94 : vector<1x8x768xbf16> to vector<8x768xbf16>
    %cst_88 = arith.constant dense<0.000000e+00> : vector<8x768xf32>
    %96 = tpu.matmul %93, %95, %cst_88 {dimension_numbers = #tpu.dot_dimension_numbers<[1], [0], [0], [1], [0, 0, 1, 1], [], []>} : vector<8x8xbf16>, vector<8x768xbf16>, vector<8x768xf32> -> vector<8x768xf32>
    %97 = arith.addf %91, %96 : vector<8x768xf32>
    %c11 = arith.constant 11 : index
    %c0_89 = arith.constant 0 : index
    %c0_90 = arith.constant 0 : index
    %98 = vector.load %arg2[%c11, %c0_89, %c0_90] : memref<16x8x8xbf16, #tpu.memory_space<vmem>>, vector<1x8x8xbf16>
    %99 = vector.shape_cast %98 : vector<1x8x8xbf16> to vector<8x8xbf16>
    %c0_91 = arith.constant 0 : index
    %c0_92 = arith.constant 0 : index
    %c37 = arith.constant 37 : index
    %100 = vector.load %arg1[%c0_91, %c0_92, %c37] : memref<1x8x806xbf16, #tpu.memory_space<vmem>>, vector<1x8x768xbf16>
    %101 = vector.shape_cast %100 : vector<1x8x768xbf16> to vector<8x768xbf16>
    %cst_93 = arith.constant dense<0.000000e+00> : vector<8x768xf32>
    %102 = tpu.matmul %99, %101, %cst_93 {dimension_numbers = #tpu.dot_dimension_numbers<[1], [0], [0], [1], [0, 0, 1, 1], [], []>} : vector<8x8xbf16>, vector<8x768xbf16>, vector<8x768xf32> -> vector<8x768xf32>
    %103 = arith.addf %97, %102 : vector<8x768xf32>
    %104 = arith.truncf %103 : vector<8x768xf32> to vector<8x768xbf16>
    %c2_94 = arith.constant 2 : index
    %c0_95 = arith.constant 0 : index
    %c0_96 = arith.constant 0 : index
    %105 = vector.load %arg4[%c2_94, %c0_95, %c0_96] : memref<4x8x768xbf16, #tpu.memory_space<vmem>>, vector<1x8x768xbf16>
    %106 = vector.shape_cast %105 : vector<1x8x768xbf16> to vector<8x768xbf16>
    %107 = vector.shape_cast %104 : vector<8x768xbf16> to vector<1x8x768xbf16>
    tpu.vector_store %arg4[%c2_94, %c0_95, %c0_96], %107 {strides = array<i32>} : memref<4x8x768xbf16, #tpu.memory_space<vmem>>, vector<1x8x768xbf16>,
    %108 = vector.broadcast %0 : vector<1x768xf32> to vector<8x768xf32>
    %109 = arith.mulf %103, %108 : vector<8x768xf32>
    %cst_97 = arith.constant dense<0.000000e+00> : vector<8xf32>
    %110 = vector.multi_reduction <add>, %109, %cst_97 [1] : vector<8x768xf32> to vector<8xf32>
    %111 = vector.shape_cast %110 : vector<8xf32> to vector<8x1xf32>
    %c0_98 = arith.constant 0 : index
    %c2_99 = arith.constant 2 : index
    %c0_100 = arith.constant 0 : index
    %c0_101 = arith.constant 0 : index
    %112 = vector.load %arg5[%c0_98, %c2_99, %c0_100, %c0_101] : memref<1x4x8x1xf32, #tpu.memory_space<vmem>>, vector<1x1x8x1xf32>
    %113 = vector.shape_cast %112 : vector<1x1x8x1xf32> to vector<8x1xf32>
    %114 = vector.shape_cast %111 : vector<8x1xf32> to vector<1x1x8x1xf32>
    tpu.vector_store %arg5[%c0_98, %c2_99, %c0_100, %c0_101], %114 {strides = array<i32>} : memref<1x4x8x1xf32, #tpu.memory_space<vmem>>, vector<1x1x8x1xf32>,
    %115 = arith.mulf %109, %103 : vector<8x768xf32>
    %cst_102 = arith.constant dense<0.000000e+00> : vector<8xf32>
    %116 = vector.multi_reduction <add>, %115, %cst_102 [1] : vector<8x768xf32> to vector<8xf32>
    %117 = vector.shape_cast %116 : vector<8xf32> to vector<8x1xf32>
    %c0_103 = arith.constant 0 : index
    %c2_104 = arith.constant 2 : index
    %c0_105 = arith.constant 0 : index
    %c0_106 = arith.constant 0 : index
    %118 = vector.load %arg6[%c0_103, %c2_104, %c0_105, %c0_106] : memref<1x4x8x1xf32, #tpu.memory_space<vmem>>, vector<1x1x8x1xf32>
    %119 = vector.shape_cast %118 : vector<1x1x8x1xf32> to vector<8x1xf32>
    %120 = vector.shape_cast %117 : vector<8x1xf32> to vector<1x1x8x1xf32>
    tpu.vector_store %arg6[%c0_103, %c2_104, %c0_105, %c0_106], %120 {strides = array<i32>} : memref<1x4x8x1xf32, #tpu.memory_space<vmem>>, vector<1x1x8x1xf32>,
    %c12 = arith.constant 12 : index
    %c0_107 = arith.constant 0 : index
    %c0_108 = arith.constant 0 : index
    %121 = vector.load %arg2[%c12, %c0_107, %c0_108] : memref<16x8x8xbf16, #tpu.memory_space<vmem>>, vector<1x8x8xbf16>
    %122 = vector.shape_cast %121 : vector<1x8x8xbf16> to vector<8x8xbf16>
    %c0_109 = arith.constant 0 : index
    %c0_110 = arith.constant 0 : index
    %c19_111 = arith.constant 19 : index
    %123 = vector.load %arg1[%c0_109, %c0_110, %c19_111] : memref<1x8x806xbf16, #tpu.memory_space<vmem>>, vector<1x8x768xbf16>
    %124 = vector.shape_cast %123 : vector<1x8x768xbf16> to vector<8x768xbf16>
    %cst_112 = arith.constant dense<0.000000e+00> : vector<8x768xf32>
    %125 = tpu.matmul %122, %124, %cst_112 {dimension_numbers = #tpu.dot_dimension_numbers<[1], [0], [0], [1], [0, 0, 1, 1], [], []>} : vector<8x8xbf16>, vector<8x768xbf16>, vector<8x768xf32> -> vector<8x768xf32>
    %c13 = arith.constant 13 : index
    %c0_113 = arith.constant 0 : index
    %c0_114 = arith.constant 0 : index
    %126 = vector.load %arg2[%c13, %c0_113, %c0_114] : memref<16x8x8xbf16, #tpu.memory_space<vmem>>, vector<1x8x8xbf16>
    %127 = vector.shape_cast %126 : vector<1x8x8xbf16> to vector<8x8xbf16>
    %c0_115 = arith.constant 0 : index
    %c0_116 = arith.constant 0 : index
    %c20_117 = arith.constant 20 : index
    %128 = vector.load %arg1[%c0_115, %c0_116, %c20_117] : memref<1x8x806xbf16, #tpu.memory_space<vmem>>, vector<1x8x768xbf16>
    %129 = vector.shape_cast %128 : vector<1x8x768xbf16> to vector<8x768xbf16>
    %cst_118 = arith.constant dense<0.000000e+00> : vector<8x768xf32>
    %130 = tpu.matmul %127, %129, %cst_118 {dimension_numbers = #tpu.dot_dimension_numbers<[1], [0], [0], [1], [0, 0, 1, 1], [], []>} : vector<8x8xbf16>, vector<8x768xbf16>, vector<8x768xf32> -> vector<8x768xf32>
    %131 = arith.addf %125, %130 : vector<8x768xf32>
    %c14 = arith.constant 14 : index
    %c0_119 = arith.constant 0 : index
    %c0_120 = arith.constant 0 : index
    %132 = vector.load %arg2[%c14, %c0_119, %c0_120] : memref<16x8x8xbf16, #tpu.memory_space<vmem>>, vector<1x8x8xbf16>
    %133 = vector.shape_cast %132 : vector<1x8x8xbf16> to vector<8x8xbf16>
    %c0_121 = arith.constant 0 : index
    %c0_122 = arith.constant 0 : index
    %c37_123 = arith.constant 37 : index
    %134 = vector.load %arg1[%c0_121, %c0_122, %c37_123] : memref<1x8x806xbf16, #tpu.memory_space<vmem>>, vector<1x8x768xbf16>
    %135 = vector.shape_cast %134 : vector<1x8x768xbf16> to vector<8x768xbf16>
    %cst_124 = arith.constant dense<0.000000e+00> : vector<8x768xf32>
    %136 = tpu.matmul %133, %135, %cst_124 {dimension_numbers = #tpu.dot_dimension_numbers<[1], [0], [0], [1], [0, 0, 1, 1], [], []>} : vector<8x8xbf16>, vector<8x768xbf16>, vector<8x768xf32> -> vector<8x768xf32>
    %137 = arith.addf %131, %136 : vector<8x768xf32>
    %c15 = arith.constant 15 : index
    %c0_125 = arith.constant 0 : index
    %c0_126 = arith.constant 0 : index
    %138 = vector.load %arg2[%c15, %c0_125, %c0_126] : memref<16x8x8xbf16, #tpu.memory_space<vmem>>, vector<1x8x8xbf16>
    %139 = vector.shape_cast %138 : vector<1x8x8xbf16> to vector<8x8xbf16>
    %c0_127 = arith.constant 0 : index
    %c0_128 = arith.constant 0 : index
    %c38 = arith.constant 38 : index
    %140 = vector.load %arg1[%c0_127, %c0_128, %c38] : memref<1x8x806xbf16, #tpu.memory_space<vmem>>, vector<1x8x768xbf16>
    %141 = vector.shape_cast %140 : vector<1x8x768xbf16> to vector<8x768xbf16>
    %cst_129 = arith.constant dense<0.000000e+00> : vector<8x768xf32>
    %142 = tpu.matmul %139, %141, %cst_129 {dimension_numbers = #tpu.dot_dimension_numbers<[1], [0], [0], [1], [0, 0, 1, 1], [], []>} : vector<8x8xbf16>, vector<8x768xbf16>, vector<8x768xf32> -> vector<8x768xf32>
    %143 = arith.addf %137, %142 : vector<8x768xf32>
    %144 = arith.truncf %143 : vector<8x768xf32> to vector<8x768xbf16>
    %c3_130 = arith.constant 3 : index
    %c0_131 = arith.constant 0 : index
    %c0_132 = arith.constant 0 : index
    %145 = vector.load %arg4[%c3_130, %c0_131, %c0_132] : memref<4x8x768xbf16, #tpu.memory_space<vmem>>, vector<1x8x768xbf16>
    %146 = vector.shape_cast %145 : vector<1x8x768xbf16> to vector<8x768xbf16>
    %147 = vector.shape_cast %144 : vector<8x768xbf16> to vector<1x8x768xbf16>
    tpu.vector_store %arg4[%c3_130, %c0_131, %c0_132], %147 {strides = array<i32>} : memref<4x8x768xbf16, #tpu.memory_space<vmem>>, vector<1x8x768xbf16>,
    %148 = vector.broadcast %0 : vector<1x768xf32> to vector<8x768xf32>
    %149 = arith.mulf %143, %148 : vector<8x768xf32>
    %cst_133 = arith.constant dense<0.000000e+00> : vector<8xf32>
    %150 = vector.multi_reduction <add>, %149, %cst_133 [1] : vector<8x768xf32> to vector<8xf32>
    %151 = vector.shape_cast %150 : vector<8xf32> to vector<8x1xf32>
    %c0_134 = arith.constant 0 : index
    %c3_135 = arith.constant 3 : index
    %c0_136 = arith.constant 0 : index
    %c0_137 = arith.constant 0 : index
    %152 = vector.load %arg5[%c0_134, %c3_135, %c0_136, %c0_137] : memref<1x4x8x1xf32, #tpu.memory_space<vmem>>, vector<1x1x8x1xf32>
    %153 = vector.shape_cast %152 : vector<1x1x8x1xf32> to vector<8x1xf32>
    %154 = vector.shape_cast %151 : vector<8x1xf32> to vector<1x1x8x1xf32>
    tpu.vector_store %arg5[%c0_134, %c3_135, %c0_136, %c0_137], %154 {strides = array<i32>} : memref<1x4x8x1xf32, #tpu.memory_space<vmem>>, vector<1x1x8x1xf32>,
    %155 = arith.mulf %149, %143 : vector<8x768xf32>
    %cst_138 = arith.constant dense<0.000000e+00> : vector<8xf32>
    %156 = vector.multi_reduction <add>, %155, %cst_138 [1] : vector<8x768xf32> to vector<8xf32>
    %157 = vector.shape_cast %156 : vector<8xf32> to vector<8x1xf32>
    %c0_139 = arith.constant 0 : index
    %c3_140 = arith.constant 3 : index
    %c0_141 = arith.constant 0 : index
    %c0_142 = arith.constant 0 : index
    %158 = vector.load %arg6[%c0_139, %c3_140, %c0_141, %c0_142] : memref<1x4x8x1xf32, #tpu.memory_space<vmem>>, vector<1x1x8x1xf32>
    %159 = vector.shape_cast %158 : vector<1x1x8x1xf32> to vector<8x1xf32>
    %160 = vector.shape_cast %157 : vector<8x1xf32> to vector<1x1x8x1xf32>
    tpu.vector_store %arg6[%c0_139, %c3_140, %c0_141, %c0_142], %160 {strides = array<i32>} : memref<1x4x8x1xf32, #tpu.memory_space<vmem>>, vector<1x1x8x1xf32>,
    return
  }
  func.func @transform_0(%arg0: i32) -> (i32, i32, i32) {
    %c0_i32 = arith.constant 0 : i32
    %c0_i32_0 = arith.constant 0 : i32
    %c0_i32_1 = arith.constant 0 : i32
    return %arg0, %c0_i32, %c0_i32_0 : i32, i32, i32
  }
  func.func @transform_1(%arg0: i32) -> (i32, i32, i32) {
    %c0_i32 = arith.constant 0 : i32
    %c0_i32_0 = arith.constant 0 : i32
    %c0_i32_1 = arith.constant 0 : i32
    %c0_i32_2 = arith.constant 0 : i32
    return %c0_i32, %c0_i32_0, %c0_i32_1 : i32, i32, i32
  }
  func.func @transform_2(%arg0: i32) -> (i32, i32) {
    %c0_i32 = arith.constant 0 : i32
    %c0_i32_0 = arith.constant 0 : i32
    return %c0_i32, %arg0 : i32, i32
  }
  func.func @transform_3(%arg0: i32) -> (i32, i32, i32) {
    %c0_i32 = arith.constant 0 : i32
    %c0_i32_0 = arith.constant 0 : i32
    %c0_i32_1 = arith.constant 0 : i32
    return %c0_i32, %c0_i32_0, %arg0 : i32, i32, i32
  }
  func.func @transform_4(%arg0: i32) -> (i32, i32, i32, i32) {
    %c0_i32 = arith.constant 0 : i32
    %c0_i32_0 = arith.constant 0 : i32
    %c0_i32_1 = arith.constant 0 : i32
    %c0_i32_2 = arith.constant 0 : i32
    return %arg0, %c0_i32, %c0_i32_0, %c0_i32_1 : i32, i32, i32, i32
  }
  func.func @transform_5(%arg0: i32) -> (i32, i32, i32, i32) {
    %c0_i32 = arith.constant 0 : i32
    %c0_i32_0 = arith.constant 0 : i32
    %c0_i32_1 = arith.constant 0 : i32
    %c0_i32_2 = arith.constant 0 : i32
    return %arg0, %c0_i32, %c0_i32_0, %c0_i32_1 : i32, i32, i32, i32
  }
}

</mosaic_0001>

<bundles_post_ra>
// kernel: uup_forward.1
= control target key start
LH: loop header
LB: loop body
LE: loop exit
PB: predicated region body
PF: predicated region fallthrough
CT: control target
= control target key end

     0   :  { %v3414_v2 = vmov 0   ;;  %s3415_s22 = smov 127   ;;  %s3416_s23 = smov 126   ;;  %vm58_vm0 = vcmask 1039360   ;;  %vm69_vm1 = vcmask 1043456   ;;  %vm828_vm2 = vcmask 1031168   ;;  %s4129_s0 = inlined_call_operand.vmem [shape: bf16[1,8,806], index: 0, kind: input, shape index: {}]   ;;  %s4130_s1 = inlined_call_operand.vmem [shape: bf16[16,8,8], index: 1, kind: input, shape index: {}]   ;;  %s4131_s2 = inlined_call_operand.vmem [shape: f32[1,768], index: 2, kind: input, shape index: {}]   ;;  %s4132_s3 = inlined_call_operand.vmem [shape: bf16[4,8,768], index: 3, kind: output, shape index: {0}]   ;;  %s4133_s4 = inlined_call_operand.vmem [shape: f32[1,4,8,1], index: 4, kind: output, shape index: {1}]   ;;  %s4134_s5 = inlined_call_operand.vmem [shape: f32[1,4,8,1], index: 5, kind: output, shape index: {2}]  }
   0x1   :  { %v21_v0 = vld [vmem:[%s4129_s0 + $0x8] sm:$0xff]  ;;  %v20_v1 = vld [vmem:[%s4129_s0] sm:$0xff]  ;;  %120 = vmatprep.mubr.bf16.mxu0 %v3414_v2  ;;  %888 = vmatprep.mubr.bf16.mxu1 %v3414_v2  ;;  %v22_v6 = vld [vmem:[%s4129_s0 + $0x10] sm:$0xff]  ;;  %s3417_s30 = smov 110   ;;  %s3418_s6 = smov 109   ;;  %vm65_vm3 = vcmask 64512  }
   0x2   :  { %v3461_v3 = vcombine.low %v21_v0, %v21_v0  ;;  %v3463_v4 = vcombine.low %v20_v1, %v20_v1  ;;  %v3469_v5 = vcombine.high %v20_v1, %v20_v1  ;;  %v3479_v7 = vcombine.low %v22_v6, %v22_v6  ;;  %v3409_v9 = vld [vmem:[%s4129_s0 + $0x18] ss:$0 sps:$4 sm:$0xff]   ;;  %s3419_s7 = smov 108   ;;  %v3073_v23 = vld [vmem:[%s4130_s1 + $0x4] sm:$0xf]  ;;  %s3420_s19 = smov 92  }
   0x3   :  { %v3481_v8 = vcombine.high %v21_v0, %v21_v0  ;;  %v3492_v10 = vcombine.high %v22_v6, %v22_v6  ;;  %v3411_v11 = vld [vmem:[%s4129_s0 + $0x18] ss:$0 sps:$4 sm:$0xff]   ;;  %v3111_v29 = vld [vmem:[%s4130_s1 + $0x14] sm:$0xf]  ;;  %v19_v54 = vld [vmem:[%s4130_s1] sm:$0xf] }
   0x4   :  { %48 = vrot.lane.b32.xlu1 %v3461_v3, %s3415_s22  ;;  %44 = vrot.lane.b32.xlu0 %v3463_v4, %s3415_s22  ;;  %v3591_v14 = vld [vmem:[%s4129_s0 + $0x18] ss:$0 sps:$4 sm:$0xff]   ;;  %v215_v47 = vsel %vm69_vm1, %v3463_v4, 0  ;;  %v221_v56 = vsel %vm69_vm1, %v3461_v3, 0  ;;  %v3110_v61 = vld [vmem:[%s4130_s1 + $0x10] sm:$0xf] }
   0x5   :  { %v3603_v20 = vld [vmem:[%s4129_s0 + $0x18] ss:$0 sps:$4 sm:$0xff]   ;;  %vm371_vm4 = vcmask 900096   ;;  %s3421_s20 = smov 91   ;;  %vm544_vm5 = vcmask 891904   ;;  %s3422_s25 = smov 90  }
   0x6   :  { %vm1331_vm6 = vcmask 883712   ;;  %vm1916_vm7 = vcmask 752640   ;;  %vm2089_vm8 = vcmask 744448   ;;  %vm2846_vm9 = vcmask 736256  }
   0x7   :  { %vm772_vm10 = vcmask 7168  }
   0x8   :  { %814 = vrot.lane.b32.xlu1 %v3463_v4, %s3416_s23  ;;  %46 = vrot.lane.b32.xlu0 %v3469_v5, %s3415_s22 }
   0xc   :  { %818 = vrot.lane.b32.xlu1 %v3461_v3, %s3416_s23  ;;  %816 = vrot.lane.b32.xlu0 %v3469_v5, %s3416_s23 }
  0x10   :  { %52 = vrot.lane.b32.xlu1 %v3479_v7, %s3415_s22  ;;  %50 = vrot.lane.b32.xlu0 %v3481_v8, %s3415_s22 }
  0x14   :  { %822 = vrot.lane.b32.xlu1 %v3479_v7, %s3416_s23  ;;  %820 = vrot.lane.b32.xlu0 %v3481_v8, %s3416_s23 }
  0x18   :  { %56 = vrot.lane.b32.xlu1 %v3409_v9, %s3415_s22  ;;  %54 = vrot.lane.b32.xlu0 %v3492_v10, %s3415_s22 }
  0x1c   :  { %826 = vrot.lane.b32.xlu1 %v3411_v11, %s3416_s23  ;;  %824 = vrot.lane.b32.xlu0 %v3492_v10, %s3416_s23 }
  0x20   :  { %981 = vrot.lane.b32.xlu1 %v3469_v5, %s3415_s22  ;;  %979 = vrot.lane.b32.xlu0 %v3463_v4, %s3415_s22 }
  0x24   :  { %985 = vrot.lane.b32.xlu1 %v3481_v8, %s3415_s22  ;;  %983 = vrot.lane.b32.xlu0 %v3461_v3, %s3415_s22 }
  0x28   :  { %989 = vrot.lane.b32.xlu1 %v3492_v10, %s3415_s22  ;;  %987 = vrot.lane.b32.xlu0 %v3479_v7, %s3415_s22 }
  0x2c   :  { %357 = vrot.lane.b32.xlu1 %v3463_v4, %s3417_s30  ;;  %991 = vrot.lane.b32.xlu0 %v3411_v11, %s3415_s22 }
  0x30   :  { %361 = vrot.lane.b32.xlu1 %v3461_v3, %s3417_s30  ;;  %359 = vrot.lane.b32.xlu0 %v3469_v5, %s3417_s30 }
  0x34   :  { %1147 = vrot.lane.b32.xlu1 %v3469_v5, %s3418_s6  ;;  %1145 = vrot.lane.b32.xlu0 %v3463_v4, %s3418_s6 }
  0x38   :  { %363 = vrot.lane.b32.xlu1 %v3481_v8, %s3417_s30  ;;  %1149 = vrot.lane.b32.xlu0 %v3461_v3, %s3418_s6 }
  0x3c   :  { %1151 = vrot.lane.b32.xlu1 %v3481_v8, %s3418_s6  ;;  %365 = vrot.lane.b32.xlu0 %v3479_v7, %s3417_s30 }
  0x40   :  { %367 = vrot.lane.b32.xlu1 %v3492_v10, %s3417_s30  ;;  %1153 = vrot.lane.b32.xlu0 %v3479_v7, %s3418_s6 }
  0x44   :  { %1155 = vrot.lane.b32.xlu1 %v3492_v10, %s3418_s6  ;;  %369 = vrot.lane.b32.xlu0 %v3409_v9, %s3417_s30 }
  0x48   :  { %530 = vrot.lane.b32.xlu1 %v3463_v4, %s3418_s6  ;;  %1157 = vrot.lane.b32.xlu0 %v3411_v11, %s3418_s6 }
  0x4c   :  { %534 = vrot.lane.b32.xlu1 %v3461_v3, %s3418_s6  ;;  %532 = vrot.lane.b32.xlu0 %v3469_v5, %s3418_s6 }
  0x50   :  { %1319 = vrot.lane.b32.xlu1 %v3469_v5, %s3419_s7  ;;  %1317 = vrot.lane.b32.xlu0 %v3463_v4, %s3419_s7 }
  0x54   :  { %536 = vrot.lane.b32.xlu1 %v3481_v8, %s3418_s6  ;;  %1321 = vrot.lane.b32.xlu0 %v3461_v3, %s3419_s7 }
  0x58   :  { %1323 = vrot.lane.b32.xlu1 %v3481_v8, %s3419_s7  ;;  %538 = vrot.lane.b32.xlu0 %v3479_v7, %s3418_s6 }
  0x5c   :  { %540 = vrot.lane.b32.xlu1 %v3492_v10, %s3418_s6  ;;  %1325 = vrot.lane.b32.xlu0 %v3479_v7, %s3419_s7 }
  0x60   :  { %1327 = vrot.lane.b32.xlu1 %v3492_v10, %s3419_s7  ;;  %542 = vrot.lane.b32.xlu0 %v3409_v9, %s3418_s6  ;;  %v227_v9 = vsel %vm69_vm1, %v3479_v7, 0 }
  0x64   :  { %1572 = vrot.lane.b32.xlu1 %v3463_v4, %s3418_s6  ;;  %1329 = vrot.lane.b32.xlu0 %v3411_v11, %s3419_s7 }
  0x68   :  { %1576 = vrot.lane.b32.xlu1 %v3461_v3, %s3418_s6  ;;  %1574 = vrot.lane.b32.xlu0 %v3469_v5, %s3418_s6 }
  0x6c   :  { %2332 = vrot.lane.b32.xlu1 %v3469_v5, %s3419_s7  ;;  %2330 = vrot.lane.b32.xlu0 %v3463_v4, %s3419_s7 }
  0x70   :  { %1578 = vrot.lane.b32.xlu1 %v3481_v8, %s3418_s6  ;;  %2334 = vrot.lane.b32.xlu0 %v3461_v3, %s3419_s7 }
  0x74   :  { %2336 = vrot.lane.b32.xlu1 %v3481_v8, %s3419_s7  ;;  %1580 = vrot.lane.b32.xlu0 %v3479_v7, %s3418_s6 }
  0x76   :  { %v49_v12 = vpop.permute.xlu1 %48  ;;  %v45_v13 = vpop.permute.xlu0 %44 }
  0x78   :  { %1582 = vrot.lane.b32.xlu1 %v3492_v10, %s3418_s6  ;;  %2338 = vrot.lane.b32.xlu0 %v3479_v7, %s3419_s7 }
  0x7a   :  { %v815_v15 = vpop.permute.xlu1 %814  ;;  %v47_v16 = vpop.permute.xlu0 %46 }
  0x7b   :  { %v60_v17 = vsel %vm58_vm0, %v47_v16, %v49_v12  ;;  %v59_v18 = vsel %vm58_vm0, %v45_v13, %v47_v16 }
  0x7c   :  { %2340 = vrot.lane.b32.xlu1 %v3492_v10, %s3419_s7  ;;  %1584 = vrot.lane.b32.xlu0 %v3591_v14, %s3418_s6  ;;  %v71_v19 = vsel %vm69_vm1, %v59_v18, 0 }
  0x7d   :  { %3081 = vmatprep.subr.msk.bf16.mxu0 %vm69_vm1, %v60_v17 }
  0x7e   :  { %89 = vmatpush1.bf16.msra.mxu0 %v71_v19  ;;  %v819_v21 = vpop.permute.xlu1 %818  ;;  %v817_v22 = vpop.permute.xlu0 %816 }
  0x7f   :  { %v830_v24 = vsel %vm828_vm2, %v817_v22, %v819_v21  ;;  %v829_v25 = vsel %vm828_vm2, %v815_v15, %v817_v22 }
  0x80   :  { %1736 = vrot.lane.b32.xlu1 %v3463_v4, %s3417_s30  ;;  %2342 = vrot.lane.b32.xlu0 %v3603_v20, %s3419_s7  ;;  %v839_v26 = vsel %vm69_vm1, %v829_v25, 0 }
  0x81   :  { %3082 = vmatmul.mubr.msk.bf16.vlgmr.msra.gmra.mrb[0].mxu0 %vm65_vm3, %v3073_v23  ;;  %3119 = vmatprep.subr.msk.bf16.mxu1 %vm69_vm1, %v830_v24 }
  0x82   :  { %857 = vmatpush1.bf16.msra.mxu1 %v839_v26  ;;  %v53_v27 = vpop.permute.xlu1 %52  ;;  %v51_v28 = vpop.permute.xlu0 %50  ;;  %161 = vmatprep.mubr.bf16.mxu0 %v3414_v2 }
  0x83   :  { %v61_v30 = vsel %vm58_vm0, %v49_v12, %v51_v28  ;;  %v62_v31 = vsel %vm58_vm0, %v51_v28, %v53_v27 }
  0x84   :  { %1740 = vrot.lane.b32.xlu1 %v3461_v3, %s3417_s30  ;;  %1738 = vrot.lane.b32.xlu0 %v3469_v5, %s3417_s30  ;;  %v77_v32 = vsel %vm69_vm1, %v61_v30, 0  ;;  %v3093_v30 = vld [vmem:[%s4130_s1 + $0x8] sm:$0xf] }
  0x85   :  { %3083 = vmatprep.subr.msk.bf16.mxu0 %vm69_vm1, %v62_v31  ;;  %3120 = vmatmul.mubr.msk.bf16.vlgmr.msra.gmra.mrb[0].mxu1 %vm65_vm3, %v3111_v29 }
  0x86   :  { %130 = vmatpush1.bf16.msra.mxu0 %v77_v32  ;;  %v823_v33 = vpop.permute.xlu1 %822  ;;  %v821_v34 = vpop.permute.xlu0 %820  ;;  %929 = vmatprep.mubr.bf16.mxu1 %v3414_v2 }
  0x87   :  { %v831_v35 = vsel %vm828_vm2, %v819_v21, %v821_v34  ;;  %v832_v36 = vsel %vm828_vm2, %v821_v34, %v823_v33 }
  0x88   :  { %2496 = vrot.lane.b32.xlu1 %v3469_v5, %s3418_s6  ;;  %2494 = vrot.lane.b32.xlu0 %v3463_v4, %s3418_s6  ;;  %v845_v37 = vsel %vm69_vm1, %v831_v35, 0 }
  0x89   :  { %3084 = vmatmul.mubr.msk.bf16.vlgmr.msra.gmra.mrb[4].mxu0 %vm65_vm3, %v3073_v23  ;;  %3121 = vmatprep.subr.msk.bf16.mxu1 %vm69_vm1, %v832_v36  ;;  %v3131_v36 = vld [vmem:[%s4130_s1 + $0x18] sm:$0xf] }
  0x8a   :  { %898 = vmatpush1.bf16.msra.mxu1 %v845_v37  ;;  %v57_v38 = vpop.permute.xlu1 %56  ;;  %v55_v39 = vpop.permute.xlu0 %54  ;;  %202 = vmatprep.mubr.bf16.mxu0 %v3414_v2 }
  0x8b   :  { %v63_v40 = vsel %vm58_vm0, %v53_v27, %v55_v39  ;;  %v64_v41 = vsel %vm58_vm0, %v55_v39, %v57_v38 }
  0x8c   :  { %1742 = vrot.lane.b32.xlu1 %v3481_v8, %s3417_s30  ;;  %2498 = vrot.lane.b32.xlu0 %v3461_v3, %s3418_s6  ;;  %v83_v42 = vsel %vm69_vm1, %v63_v40, 0 }
  0x8d   :  { %3085 = vmatprep.subr.msk.bf16.mxu0 %vm69_vm1, %v64_v41  ;;  %3122 = vmatmul.mubr.msk.bf16.vlgmr.msra.gmra.mrb[4].mxu1 %vm65_vm3, %v3111_v29 }
  0x8e   :  { %171 = vmatpush1.bf16.msra.mxu0 %v83_v42  ;;  %v827_v43 = vpop.permute.xlu1 %826  ;;  %v825_v44 = vpop.permute.xlu0 %824  ;;  %970 = vmatprep.mubr.bf16.mxu1 %v3414_v2 }
  0x8f   :  { %v833_v45 = vsel %vm828_vm2, %v823_v33, %v825_v44  ;;  %v834_v46 = vsel %vm828_vm2, %v825_v44, %v827_v43  ;;  %3087 = vmatprep.subr.msk.bf16.mxu0 %vm69_vm1, %v3469_v5 }
  0x90   :  { %2500 = vrot.lane.b32.xlu1 %v3481_v8, %s3418_s6  ;;  %1744 = vrot.lane.b32.xlu0 %v3479_v7, %s3417_s30  ;;  %v851_v48 = vsel %vm69_vm1, %v833_v45, 0 }
  0x91   :  { %3086 = vmatmul.mubr.msk.bf16.vlgmr.msra.gmra.mrb[8].mxu0 %vm65_vm3, %v3073_v23  ;;  %3123 = vmatprep.subr.msk.bf16.mxu1 %vm69_vm1, %v834_v46 }
  0x92   :  { %939 = vmatpush1.bf16.msra.mxu1 %v851_v48  ;;  %v982_v49 = vpop.permute.xlu1 %981  ;;  %v980_v50 = vpop.permute.xlu0 %979  ;;  %233 = vmatpush1.bf16.msra.mxu0 %v215_v47 }
  0x93   :  { %264 = vmatprep.mubr.bf16.mxu0 %v3414_v2  ;;  %3089 = vmatprep.subr.msk.bf16.mxu0 %vm69_vm1, %v3481_v8  ;;  %v993_v51 = vsel %vm58_vm0, %v980_v50, %v982_v49 }
  0x94   :  { %1746 = vrot.lane.b32.xlu1 %v3492_v10, %s3417_s30  ;;  %2502 = vrot.lane.b32.xlu0 %v3479_v7, %s3418_s6  ;;  %v1003_v57 = vsel %vm69_vm1, %v993_v51, 0 }
  0x95   :  { %3124 = vmatmul.mubr.msk.bf16.vlgmr.msra.gmra.mrb[8].mxu1 %vm65_vm3, %v3111_v29 }
  0x96   :  { %v986_v52 = vpop.permute.xlu1 %985  ;;  %v984_v53 = vpop.permute.xlu0 %983  ;;  %1052 = vmatprep.mubr.bf16.mxu1 %v3414_v2 }
  0x97   :  { %v994_v55 = vsel %vm58_vm0, %v982_v49, %v984_v53  ;;  %v995_v58 = vsel %vm58_vm0, %v984_v53, %v986_v52 }
  0x98   :  { %2504 = vrot.lane.b32.xlu1 %v3492_v10, %s3418_s6  ;;  %1748 = vrot.lane.b32.xlu0 %v3591_v14, %s3417_s30  ;;  %v1009_v63 = vsel %vm69_vm1, %v995_v58, 0 }
  0x99   :  { %3088 = vmatmul.mubr.msk.bf16.vlgmr.msra.gmra.mrb[0].mxu0 %vm65_vm3, %v19_v54  ;;  %3125 = vmatprep.subr.msk.bf16.mxu1 %vm69_vm1, %v994_v55 }
  0x9a   :  { %1021 = vmatpush1.bf16.msra.mxu1 %v1003_v57  ;;  %v990_v59 = vpop.permute.xlu1 %989  ;;  %v988_v60 = vpop.permute.xlu0 %987  ;;  %274 = vmatpush1.bf16.msra.mxu0 %v221_v56  ;;  %v3100_v57 = vld [vmem:[%s4130_s1 + $0xc] sm:$0xf] }
  0x9b   :  { %v996_v62 = vsel %vm58_vm0, %v986_v52, %v988_v60  ;;  %305 = vmatprep.mubr.bf16.mxu0 %v3414_v2  ;;  %3091 = vmatprep.subr.msk.bf16.mxu0 %vm69_vm1, %v3492_v10  ;;  %v997_v11 = vsel %vm58_vm0, %v988_v60, %v990_v59 }
  0x9c   :  { %1902 = vrot.lane.b32.xlu1 %v3463_v4, %s3420_s19  ;;  %2506 = vrot.lane.b32.xlu0 %v3603_v20, %s3418_s6  ;;  %v1015_v16 = vsel %vm69_vm1, %v997_v11, 0 }
  0x9d   :  { %3126 = vmatmul.mubr.msk.bf16.vlgmr.msra.gmra.mrb[0].mxu1 %vm65_vm3, %v3110_v61  ;;  %3127 = vmatprep.subr.msk.bf16.mxu1 %vm69_vm1, %v996_v62  ;;  %v3138_v62 = vld [vmem:[%s4130_s1 + $0x1c] sm:$0xf] }
  0x9e   :  { %1062 = vmatpush1.bf16.msra.mxu1 %v1009_v63  ;;  %v358_v0 = vpop.permute.xlu1 %357  ;;  %v992_v1 = vpop.permute.xlu0 %991  ;;  %1093 = vmatprep.mubr.bf16.mxu1 %v3414_v2 }
  0x9f   :  { %v998_v6 = vsel %vm58_vm0, %v990_v59, %v992_v1 }
  0xa0   :  { %1906 = vrot.lane.b32.xlu1 %v3461_v3, %s3420_s19  ;;  %1904 = vrot.lane.b32.xlu0 %v3469_v5, %s3420_s19 }
  0xa1   :  { %3090 = vmatmul.mubr.msk.bf16.vlgmr.msra.gmra.mrb[4].mxu0 %vm65_vm3, %v19_v54  ;;  %3129 = vmatprep.subr.msk.bf16.mxu1 %vm69_vm1, %v998_v6 }
  0xa2   :  { %v362_v12 = vpop.permute.xlu1 %361  ;;  %v360_v13 = vpop.permute.xlu0 %359  ;;  %315 = vmatpush1.bf16.msra.mxu0 %v227_v9  ;;  %346 = vmatprep.mubr.bf16.mxu0 %v3414_v2 }
  0xa3   :  { %v373_v15 = vsel %vm371_vm4, %v360_v13, %v362_v12  ;;  %v372_v17 = vsel %vm371_vm4, %v358_v0, %v360_v13 }
  0xa4   :  { %2662 = vrot.lane.b32.xlu1 %v3469_v5, %s3421_s20  ;;  %2660 = vrot.lane.b32.xlu0 %v3463_v4, %s3421_s20  ;;  %v382_v21 = vsel %vm69_vm1, %v372_v17, 0 }
  0xa5   :  { %3094 = vmatprep.subr.msk.bf16.mxu0 %vm69_vm1, %v373_v15  ;;  %3128 = vmatmul.mubr.msk.bf16.vlgmr.msra.gmra.mrb[4].mxu1 %vm65_vm3, %v3110_v61 }
  0xa6   :  { %1103 = vmatpush1.bf16.msra.mxu1 %v1015_v16  ;;  %v1148_v18 = vpop.permute.xlu1 %1147  ;;  %v1146_v19 = vpop.permute.xlu0 %1145  ;;  %1134 = vmatprep.mubr.bf16.mxu1 %v3414_v2 }
  0xa7   :  { %v1159_v22 = vsel %vm544_vm5, %v1146_v19, %v1148_v18 }
  0xa8   :  { %1908 = vrot.lane.b32.xlu1 %v3481_v8, %s3420_s19  ;;  %2664 = vrot.lane.b32.xlu0 %v3461_v3, %s3421_s20  ;;  %v1169_v26 = vsel %vm69_vm1, %v1159_v22, 0 }
  0xa9   :  { %3092 = vmatmul.mubr.msk.bf16.vlgmr.msra.gmra.mrb[8].mxu0 %vm65_vm3, %v19_v54 }
  0xaa   :  { %400 = vmatpush1.bf16.msra.mxu0 %v382_v21  ;;  %v364_v23 = vpop.permute.xlu1 %363  ;;  %v1150_v24 = vpop.permute.xlu0 %1149  ;;  %431 = vmatprep.mubr.bf16.mxu0 %v3414_v2 }
  0xab   :  { %v1160_v25 = vsel %vm544_vm5, %v1148_v18, %v1150_v24  ;;  %v374_v27 = vsel %vm371_vm4, %v362_v12, %v364_v23 }
  0xac   :  { %2666 = vrot.lane.b32.xlu1 %v3481_v8, %s3421_s20  ;;  %1910 = vrot.lane.b32.xlu0 %v3479_v7, %s3420_s19  ;;  %v388_v32 = vsel %vm69_vm1, %v374_v27, 0  ;;  %v3154_v27 = vld [vmem:[%s4130_s1 + $0x24] sm:$0xf] }
  0xad   :  { %3130 = vmatmul.mubr.msk.bf16.vlgmr.msra.gmra.mrb[8].mxu1 %vm65_vm3, %v3110_v61  ;;  %3132 = vmatprep.subr.msk.bf16.mxu1 %vm69_vm1, %v1160_v25 }
  0xae   :  { %1187 = vmatpush1.bf16.msra.mxu1 %v1169_v26  ;;  %v1152_v28 = vpop.permute.xlu1 %1151  ;;  %v366_v29 = vpop.permute.xlu0 %365  ;;  %1218 = vmatprep.mubr.bf16.mxu1 %v3414_v2 }
  0xaf   :  { %v375_v31 = vsel %vm371_vm4, %v364_v23, %v366_v29  ;;  %v1161_v33 = vsel %vm544_vm5, %v1150_v24, %v1152_v28 }
  0xb0   :  { %1912 = vrot.lane.b32.xlu1 %v3492_v10, %s3420_s19  ;;  %2668 = vrot.lane.b32.xlu0 %v3479_v7, %s3421_s20  ;;  %v1175_v38 = vsel %vm69_vm1, %v1161_v33, 0 }
  0xb1   :  { %3095 = vmatmul.mubr.msk.bf16.vlgmr.msra.gmra.mrb[0].mxu0 %vm65_vm3, %v3093_v30  ;;  %3096 = vmatprep.subr.msk.bf16.mxu0 %vm69_vm1, %v375_v31 }
  0xb2   :  { %441 = vmatpush1.bf16.msra.mxu0 %v388_v32  ;;  %v368_v34 = vpop.permute.xlu1 %367  ;;  %v1154_v35 = vpop.permute.xlu0 %1153  ;;  %472 = vmatprep.mubr.bf16.mxu0 %v3414_v2 }
  0xb3   :  { %v1162_v37 = vsel %vm544_vm5, %v1152_v28, %v1154_v35  ;;  %v376_v39 = vsel %vm371_vm4, %v366_v29, %v368_v34 }
  0xb4   :  { %2670 = vrot.lane.b32.xlu1 %v3492_v10, %s3421_s20  ;;  %1914 = vrot.lane.b32.xlu0 %v3591_v14, %s3420_s19  ;;  %v394_v43 = vsel %vm69_vm1, %v376_v39, 0 }
  0xb5   :  { %3133 = vmatmul.mubr.msk.bf16.vlgmr.msra.gmra.mrb[0].mxu1 %vm65_vm3, %v3131_v36  ;;  %3134 = vmatprep.subr.msk.bf16.mxu1 %vm69_vm1, %v1162_v37 }
  0xb6   :  { %1228 = vmatpush1.bf16.msra.mxu1 %v1175_v38  ;;  %v1156_v40 = vpop.permute.xlu1 %1155  ;;  %v370_v41 = vpop.permute.xlu0 %369  ;;  %1259 = vmatprep.mubr.bf16.mxu1 %v3414_v2 }
  0xb7   :  { %v377_v42 = vsel %vm371_vm4, %v368_v34, %v370_v41  ;;  %v1163_v44 = vsel %vm544_vm5, %v1154_v35, %v1156_v40  ;;  %v3197_v34 = vld [vmem:[%s4130_s1 + $0x34] sm:$0xf] }
  0xb8   :  { %2075 = vrot.lane.b32.xlu1 %v3463_v4, %s3421_s20  ;;  %2672 = vrot.lane.b32.xlu0 %v3603_v20, %s3421_s20  ;;  %v1181_v48 = vsel %vm69_vm1, %v1163_v44, 0 }
  0xb9   :  { %3097 = vmatmul.mubr.msk.bf16.vlgmr.msra.gmra.mrb[4].mxu0 %vm65_vm3, %v3093_v30  ;;  %3098 = vmatprep.subr.msk.bf16.mxu0 %vm69_vm1, %v377_v42 }
  0xba   :  { %482 = vmatpush1.bf16.msra.mxu0 %v394_v43  ;;  %v531_v45 = vpop.permute.xlu1 %530  ;;  %v1158_v46 = vpop.permute.xlu0 %1157  ;;  %513 = vmatprep.mubr.bf16.mxu0 %v3414_v2 }
  0xbb   :  { %v1164_v47 = vsel %vm544_vm5, %v1156_v40, %v1158_v46 }
  0xbc   :  { %2079 = vrot.lane.b32.xlu1 %v3461_v3, %s3421_s20  ;;  %2077 = vrot.lane.b32.xlu0 %v3469_v5, %s3421_s20 }
  0xbd   :  { %3135 = vmatmul.mubr.msk.bf16.vlgmr.msra.gmra.mrb[4].mxu1 %vm65_vm3, %v3131_v36  ;;  %3136 = vmatprep.subr.msk.bf16.mxu1 %vm69_vm1, %v1164_v47 }
  0xbe   :  { %1269 = vmatpush1.bf16.msra.mxu1 %v1181_v48  ;;  %v535_v49 = vpop.permute.xlu1 %534  ;;  %v533_v50 = vpop.permute.xlu0 %532  ;;  %1300 = vmatprep.mubr.bf16.mxu1 %v3414_v2 }
  0xbf   :  { %v545_v51 = vsel %vm544_vm5, %v531_v45, %v533_v50  ;;  %v546_v52 = vsel %vm544_vm5, %v533_v50, %v535_v49 }
  0xc0   :  { %v555_v53 = vsel %vm69_vm1, %v545_v51, 0  ;;  %2834 = vrot.lane.b32.xlu1 %v3469_v5, %s3422_s25  ;;  %2832 = vrot.lane.b32.xlu0 %v3463_v4, %s3422_s25 }
  0xc1   :  { %3099 = vmatmul.mubr.msk.bf16.vlgmr.msra.gmra.mrb[8].mxu0 %vm65_vm3, %v3093_v30  ;;  %3101 = vmatprep.subr.msk.bf16.mxu0 %vm69_vm1, %v546_v52 }
  0xc2   :  { %573 = vmatpush1.bf16.msra.mxu0 %v555_v53  ;;  %v1320_v54 = vpop.permute.xlu1 %1319  ;;  %v1318_v55 = vpop.permute.xlu0 %1317  ;;  %604 = vmatprep.mubr.bf16.mxu0 %v3414_v2 }
  0xc3   :  { %v1332_v4 = vsel %vm1331_vm6, %v1318_v55, %v1320_v54 }
  0xc4   :  { %2081 = vrot.lane.b32.xlu1 %v3481_v8, %s3421_s20  ;;  %2836 = vrot.lane.b32.xlu0 %v3461_v3, %s3422_s25  ;;  %v1342_v3 = vsel %vm69_vm1, %v1332_v4, 0 }
  0xc5   :  { %3137 = vmatmul.mubr.msk.bf16.vlgmr.msra.gmra.mrb[8].mxu1 %vm65_vm3, %v3131_v36 }
  0xc6   :  { %v537_v5 = vpop.permute.xlu1 %536  ;;  %v1322_v56 = vpop.permute.xlu0 %1321  ;;  %1391 = vmatprep.mubr.bf16.mxu1 %v3414_v2 }
  0xc7   :  { %v1333_v58 = vsel %vm1331_vm6, %v1320_v54, %v1322_v56  ;;  %v547_v59 = vsel %vm544_vm5, %v535_v49, %v537_v5 }
  0xc8   :  { %2838 = vrot.lane.b32.xlu1 %v3481_v8, %s3422_s25  ;;  %2083 = vrot.lane.b32.xlu0 %v3479_v7, %s3421_s20  ;;  %v561_v63 = vsel %vm69_vm1, %v547_v59, 0 }
  0xc9   :  { %3102 = vmatmul.mubr.msk.bf16.vlgmr.msra.gmra.mrb[0].mxu0 %vm65_vm3, %v3100_v57  ;;  %3139 = vmatprep.subr.msk.bf16.mxu1 %vm69_vm1, %v1333_v58 }
  0xca   :  { %1360 = vmatpush1.bf16.msra.mxu1 %v1342_v3  ;;  %v1324_v60 = vpop.permute.xlu1 %1323  ;;  %v539_v61 = vpop.permute.xlu0 %538  ;;  %645 = vmatprep.mubr.bf16.mxu0 %v3414_v2 }
  0xcb   :  { %v548_v8 = vsel %vm544_vm5, %v537_v5, %v539_v61  ;;  %v1334_v0 = vsel %vm1331_vm6, %v1322_v56, %v1324_v60 }
  0xcc   :  { %2085 = vrot.lane.b32.xlu1 %v3492_v10, %s3421_s20  ;;  %2840 = vrot.lane.b32.xlu0 %v3479_v7, %s3422_s25  ;;  %v1348_v7 = vsel %vm69_vm1, %v1334_v0, 0  ;;  %v3196_v0 = vld [vmem:[%s4130_s1 + $0x30] sm:$0xf] }
  0xcd   :  { %3103 = vmatprep.subr.msk.bf16.mxu0 %vm69_vm1, %v548_v8  ;;  %3140 = vmatmul.mubr.msk.bf16.vlgmr.msra.gmra.mrb[0].mxu1 %vm65_vm3, %v3138_v62 }
  0xce   :  { %614 = vmatpush1.bf16.msra.mxu0 %v561_v63  ;;  %v541_v1 = vpop.permute.xlu1 %540  ;;  %v1326_v6 = vpop.permute.xlu0 %1325  ;;  %1432 = vmatprep.mubr.bf16.mxu1 %v3414_v2 }
  0xcf   :  { %v1335_v9 = vsel %vm1331_vm6, %v1324_v60, %v1326_v6  ;;  %v549_v11 = vsel %vm544_vm5, %v539_v61, %v541_v1 }
  0xd0   :  { %2842 = vrot.lane.b32.xlu1 %v3492_v10, %s3422_s25  ;;  %2087 = vrot.lane.b32.xlu0 %v3591_v14, %s3421_s20  ;;  %v567_v10 = vsel %vm69_vm1, %v549_v11, 0 }
  0xd1   :  { %3104 = vmatmul.mubr.msk.bf16.vlgmr.msra.gmra.mrb[4].mxu0 %vm65_vm3, %v3100_v57  ;;  %3141 = vmatprep.subr.msk.bf16.mxu1 %vm69_vm1, %v1335_v9 }
  0xd2   :  { %1401 = vmatpush1.bf16.msra.mxu1 %v1348_v7  ;;  %v1328_v12 = vpop.permute.xlu1 %1327  ;;  %v543_v13 = vpop.permute.xlu0 %542  ;;  %686 = vmatprep.mubr.bf16.mxu0 %v3414_v2 }
  0xd3   :  { %v550_v15 = vsel %vm544_vm5, %v541_v1, %v543_v13  ;;  %v1336_v14 = vsel %vm1331_vm6, %v1326_v6, %v1328_v12 }
  0xd4   :  { %2844 = vrot.lane.b32.xlu0 %v3603_v20, %s3422_s25  ;;  %3105 = vmatprep.subr.msk.bf16.mxu0 %vm69_vm1, %v550_v15  ;;  %v1354_v19 = vsel %vm69_vm1, %v1336_v14, 0 }
  0xd5   :  { %3142 = vmatmul.mubr.msk.bf16.vlgmr.msra.gmra.mrb[4].mxu1 %vm65_vm3, %v3138_v62  ;;  %655 = vmatpush1.bf16.msra.mxu0 %v567_v10 }
  0xd6   :  { %v1573_v16 = vpop.permute.xlu1 %1572  ;;  %v1330_v17 = vpop.permute.xlu0 %1329  ;;  %1473 = vmatprep.mubr.bf16.mxu1 %v3414_v2 }
  0xd7   :  { %v1337_v18 = vsel %vm1331_vm6, %v1328_v12, %v1330_v17 }
  0xd8   :  { %3143 = vmatprep.subr.msk.bf16.mxu1 %vm69_vm1, %v1337_v18 }
  0xd9   :  { %3106 = vmatmul.mubr.msk.bf16.vlgmr.msra.gmra.mrb[8].mxu0 %vm65_vm3, %v3100_v57  ;;  %1442 = vmatpush1.bf16.msra.mxu1 %v1354_v19  ;;  %v3153_v57 = vld [vmem:[%s4130_s1 + $0x20] sm:$0xf] }
  0xda   :  { %v1577_v20 = vpop.permute.xlu1 %1576  ;;  %v1575_v21 = vpop.permute.xlu0 %1574  ;;  %1645 = vmatprep.mubr.bf16.mxu0 %v3414_v2 }
  0xdb   :  { %v1586_v22 = vsel %vm544_vm5, %v1573_v16, %v1575_v21  ;;  %v1587_v23 = vsel %vm544_vm5, %v1575_v21, %v1577_v20 }
  0xdc   :  { %v1596_v24 = vsel %vm69_vm1, %v1586_v22, 0  ;;  %3162 = vmatprep.subr.msk.bf16.mxu0 %vm69_vm1, %v1587_v23 }
  0xdd   :  { %3144 = vmatmul.mubr.msk.bf16.vlgmr.msra.gmra.mrb[8].mxu1 %vm65_vm3, %v3138_v62  ;;  %1614 = vmatpush1.bf16.msra.mxu0 %v1596_v24 }
  0xde   :  { %v2333_v25 = vpop.permute.xlu1 %2332  ;;  %v2331_v26 = vpop.permute.xlu0 %2330  ;;  %2403 = vmatprep.mubr.bf16.mxu1 %v3414_v2 }
  0xdf   :  { %v2344_v28 = vsel %vm1331_vm6, %v2331_v26, %v2333_v25 }
  0xe0   :  { %v2354_v32 = vsel %vm69_vm1, %v2344_v28, 0 }
  0xe1   :  { %3163 = vmatmul.mubr.msk.bf16.vlgmr.msra.gmra.mrb[12].mxu0 %vm65_vm3, %v3154_v27 }
  0xe2   :  { %v1579_v29 = vpop.permute.xlu1 %1578  ;;  %v2335_v30 = vpop.permute.xlu0 %2334  ;;  %1686 = vmatprep.mubr.bf16.mxu0 %v3414_v2 }
  0xe3   :  { %v2345_v31 = vsel %vm1331_vm6, %v2333_v25, %v2335_v30  ;;  %v1588_v33 = vsel %vm544_vm5, %v1577_v20, %v1579_v29 }
  0xe4   :  { %3205 = vmatprep.subr.msk.bf16.mxu1 %vm69_vm1, %v2345_v31  ;;  %v1602_v38 = vsel %vm69_vm1, %v1588_v33, 0 }
  0xe5   :  { %2372 = vmatpush1.bf16.msra.mxu1 %v2354_v32 }
  0xe6   :  { %v2337_v35 = vpop.permute.xlu1 %2336  ;;  %v1581_v36 = vpop.permute.xlu0 %1580 }
  0xe7   :  { %v1589_v37 = vsel %vm544_vm5, %v1579_v29, %v1581_v36  ;;  %v2346_v39 = vsel %vm1331_vm6, %v2335_v30, %v2337_v35  ;;  %v3174_v30 = vld [vmem:[%s4130_s1 + $0x28] sm:$0xf] }
  0xe8   :  { %3164 = vmatprep.subr.msk.bf16.mxu0 %vm69_vm1, %v1589_v37  ;;  %3206 = vmatmul.mubr.msk.bf16.vlgmr.msra.gmra.mrb[12].mxu1 %vm65_vm3, %v3197_v34  ;;  %v2360_v43 = vsel %vm69_vm1, %v2346_v39, 0  ;;  %v3217_v39 = vld [vmem:[%s4130_s1 + $0x38] sm:$0xf] }
  0xe9   :  { %1655 = vmatpush1.bf16.msra.mxu0 %v1602_v38  ;;  %2444 = vmatprep.mubr.bf16.mxu1 %v3414_v2 }
  0xea   :  { %v1583_v40 = vpop.permute.xlu1 %1582  ;;  %v2339_v41 = vpop.permute.xlu0 %2338 }
  0xeb   :  { %v2347_v42 = vsel %vm1331_vm6, %v2337_v35, %v2339_v41  ;;  %v1590_v44 = vsel %vm544_vm5, %v1581_v36, %v1583_v40 }
  0xec   :  { %3207 = vmatprep.subr.msk.bf16.mxu1 %vm69_vm1, %v2347_v42  ;;  %3165 = vmatmul.mubr.msk.bf16.vlgmr.msra.gmra.mrb[16].mxu0 %vm65_vm3, %v3154_v27  ;;  %v1608_v48 = vsel %vm69_vm1, %v1590_v44, 0 }
  0xed   :  { %2413 = vmatpush1.bf16.msra.mxu1 %v2360_v43  ;;  %1727 = vmatprep.mubr.bf16.mxu0 %v3414_v2 }
  0xee   :  { %v2341_v45 = vpop.permute.xlu1 %2340  ;;  %v1585_v46 = vpop.permute.xlu0 %1584 }
  0xef   :  { %v1591_v47 = vsel %vm544_vm5, %v1583_v40, %v1585_v46  ;;  %v2348_v49 = vsel %vm1331_vm6, %v2339_v41, %v2341_v45 }
  0xf0   :  { %3166 = vmatprep.subr.msk.bf16.mxu0 %vm69_vm1, %v1591_v47  ;;  %3208 = vmatmul.mubr.msk.bf16.vlgmr.msra.gmra.mrb[16].mxu1 %vm65_vm3, %v3197_v34  ;;  %v2366_v53 = vsel %vm69_vm1, %v2348_v49, 0 }
  0xf1   :  { %1696 = vmatpush1.bf16.msra.mxu0 %v1608_v48  ;;  %2485 = vmatprep.mubr.bf16.mxu1 %v3414_v2 }
  0xf2   :  { %v1737_v50 = vpop.permute.xlu1 %1736  ;;  %v2343_v51 = vpop.permute.xlu0 %2342 }
  0xf3   :  { %v2349_v52 = vsel %vm1331_vm6, %v2341_v45, %v2343_v51 }
  0xf4   :  { %3209 = vmatprep.subr.msk.bf16.mxu1 %vm69_vm1, %v2349_v52  ;;  %3167 = vmatmul.mubr.msk.bf16.vlgmr.msra.gmra.mrb[20].mxu0 %vm65_vm3, %v3154_v27 }
  0xf5   :  { %2454 = vmatpush1.bf16.msra.mxu1 %v2366_v53  ;;  %1809 = vmatprep.mubr.bf16.mxu0 %v3414_v2 }
  0xf6   :  { %v1741_v54 = vpop.permute.xlu1 %1740  ;;  %v1739_v55 = vpop.permute.xlu0 %1738 }
  0xf7   :  { %v1750_v4 = vsel %vm371_vm4, %v1737_v50, %v1739_v55  ;;  %v1751_v5 = vsel %vm371_vm4, %v1739_v55, %v1741_v54 }
  0xf8   :  { %v1760_v56 = vsel %vm69_vm1, %v1750_v4, 0  ;;  %3168 = vmatprep.subr.msk.bf16.mxu0 %vm69_vm1, %v1751_v5  ;;  %3210 = vmatmul.mubr.msk.bf16.vlgmr.msra.gmra.mrb[20].mxu1 %vm65_vm3, %v3197_v34 }
  0xf9   :  { %1778 = vmatpush1.bf16.msra.mxu0 %v1760_v56  ;;  %2567 = vmatprep.mubr.bf16.mxu1 %v3414_v2 }
  0xfa   :  { %v2497_v58 = vpop.permute.xlu1 %2496  ;;  %v2495_v3 = vpop.permute.xlu0 %2494 }
  0xfb   :  { %v2508_v59 = vsel %vm544_vm5, %v2495_v3, %v2497_v58 }
  0xfc   :  { %3169 = vmatmul.mubr.msk.bf16.vlgmr.msra.gmra.mrb[12].mxu0 %vm65_vm3, %v3153_v57  ;;  %v2518_v8 = vsel %vm69_vm1, %v2508_v59, 0 }
  0xfd   :  { %1850 = vmatprep.mubr.bf16.mxu0 %v3414_v2 }
  0xfe   :  { %v1743_v60 = vpop.permute.xlu1 %1742  ;;  %v2499_v61 = vpop.permute.xlu0 %2498 }
  0xff   :  { %v2509_v62 = vsel %vm544_vm5, %v2497_v58, %v2499_v61  ;;  %v1752_v63 = vsel %vm371_vm4, %v1741_v54, %v1743_v60 }
 0x100   :  { %3211 = vmatprep.subr.msk.bf16.mxu1 %vm69_vm1, %v2509_v62  ;;  %v1766_v7 = vsel %vm69_vm1, %v1752_v63, 0 }
 0x101   :  { %2536 = vmatpush1.bf16.msra.mxu1 %v2518_v8 }
 0x102   :  { %v2501_v1 = vpop.permute.xlu1 %2500  ;;  %v1745_v6 = vpop.permute.xlu0 %1744 }
 0x103   :  { %v1753_v9 = vsel %vm371_vm4, %v1743_v60, %v1745_v6  ;;  %v2510_v11 = vsel %vm544_vm5, %v2499_v61, %v2501_v1  ;;  %v3181_v61 = vld [vmem:[%s4130_s1 + $0x2c] sm:$0xf] }
 0x104   :  { %3170 = vmatprep.subr.msk.bf16.mxu0 %vm69_vm1, %v1753_v9  ;;  %3212 = vmatmul.mubr.msk.bf16.vlgmr.msra.gmra.mrb[12].mxu1 %vm65_vm3, %v3196_v0  ;;  %v2524_v10 = vsel %vm69_vm1, %v2510_v11, 0  ;;  %v3224_v11 = vld [vmem:[%s4130_s1 + $0x3c] sm:$0xf] }
 0x105   :  { %1819 = vmatpush1.bf16.msra.mxu0 %v1766_v7  ;;  %2608 = vmatprep.mubr.bf16.mxu1 %v3414_v2 }
 0x106   :  { %v1747_v12 = vpop.permute.xlu1 %1746  ;;  %v2503_v13 = vpop.permute.xlu0 %2502 }
 0x107   :  { %v2511_v15 = vsel %vm544_vm5, %v2501_v1, %v2503_v13  ;;  %v1754_v14 = vsel %vm371_vm4, %v1745_v6, %v1747_v12 }
 0x108   :  { %3213 = vmatprep.subr.msk.bf16.mxu1 %vm69_vm1, %v2511_v15  ;;  %3171 = vmatmul.mubr.msk.bf16.vlgmr.msra.gmra.mrb[16].mxu0 %vm65_vm3, %v3153_v57  ;;  %v1772_v19 = vsel %vm69_vm1, %v1754_v14, 0 }
 0x109   :  { %2577 = vmatpush1.bf16.msra.mxu1 %v2524_v10  ;;  %1891 = vmatprep.mubr.bf16.mxu0 %v3414_v2 }
 0x10a   :  { %v2505_v16 = vpop.permute.xlu1 %2504  ;;  %v1749_v17 = vpop.permute.xlu0 %1748 }
 0x10b   :  { %v1755_v18 = vsel %vm371_vm4, %v1747_v12, %v1749_v17  ;;  %v2512_v20 = vsel %vm544_vm5, %v2503_v13, %v2505_v16 }
 0x10c   :  { %3172 = vmatprep.subr.msk.bf16.mxu0 %vm69_vm1, %v1755_v18  ;;  %3214 = vmatmul.mubr.msk.bf16.vlgmr.msra.gmra.mrb[16].mxu1 %vm65_vm3, %v3196_v0  ;;  %v2530_v24 = vsel %vm69_vm1, %v2512_v20, 0 }
 0x10d   :  { %1860 = vmatpush1.bf16.msra.mxu0 %v1772_v19  ;;  %2649 = vmatprep.mubr.bf16.mxu1 %v3414_v2 }
 0x10e   :  { %v1903_v21 = vpop.permute.xlu1 %1902  ;;  %v2507_v22 = vpop.permute.xlu0 %2506 }
 0x10f   :  { %v2513_v23 = vsel %vm544_vm5, %v2505_v16, %v2507_v22 }
 0x110   :  { %3215 = vmatprep.subr.msk.bf16.mxu1 %vm69_vm1, %v2513_v23  ;;  %3173 = vmatmul.mubr.msk.bf16.vlgmr.msra.gmra.mrb[20].mxu0 %vm65_vm3, %v3153_v57 }
 0x111   :  { %2618 = vmatpush1.bf16.msra.mxu1 %v2530_v24  ;;  %1976 = vmatprep.mubr.bf16.mxu0 %v3414_v2 }
 0x112   :  { %v1907_v25 = vpop.permute.xlu1 %1906  ;;  %v1905_v26 = vpop.permute.xlu0 %1904 }
 0x113   :  { %v1917_v27 = vsel %vm1916_vm7, %v1903_v21, %v1905_v26  ;;  %v1918_v28 = vsel %vm1916_vm7, %v1905_v26, %v1907_v25 }
 0x114   :  { %v1927_v29 = vsel %vm69_vm1, %v1917_v27, 0  ;;  %3175 = vmatprep.subr.msk.bf16.mxu0 %vm69_vm1, %v1918_v28  ;;  %3216 = vmatmul.mubr.msk.bf16.vlgmr.msra.gmra.mrb[20].mxu1 %vm65_vm3, %v3196_v0 }
 0x115   :  { %1945 = vmatpush1.bf16.msra.mxu0 %v1927_v29  ;;  %2733 = vmatprep.mubr.bf16.mxu1 %v3414_v2  ;;  %v729_v29 = vlaneseq }
 0x116   :  { %v2663_v31 = vpop.permute.xlu1 %2662  ;;  %v2661_v32 = vpop.permute.xlu0 %2660 }
 0x117   :  { %v2674_v33 = vsel %vm2089_vm8, %v2661_v32, %v2663_v31  ;;  %v18_v32 = vld [vmem:[%s4131_s2] sm:$0x3f] }
 0x118   :  { %3176 = vmatmul.mubr.msk.bf16.vlgmr.msra.gmra.mrb[12].mxu0 %vm65_vm3, %v3174_v30  ;;  %v2684_v37 = vsel %vm69_vm1, %v2674_v33, 0 }
 0x119   :  { %2017 = vmatprep.mubr.bf16.mxu0 %v3414_v2 }
 0x11a   :  { %v1909_v34 = vpop.permute.xlu1 %1908  ;;  %v2665_v35 = vpop.permute.xlu0 %2664 }
 0x11b   :  { %v2675_v36 = vsel %vm2089_vm8, %v2663_v31, %v2665_v35  ;;  %v1919_v38 = vsel %vm1916_vm7, %v1907_v25, %v1909_v34 }
 0x11c   :  { %3218 = vmatprep.subr.msk.bf16.mxu1 %vm69_vm1, %v2675_v36  ;;  %v1933_v43 = vsel %vm69_vm1, %v1919_v38, 0 }
 0x11d   :  { %2702 = vmatpush1.bf16.msra.mxu1 %v2684_v37 }
 0x11e   :  { %v2667_v40 = vpop.permute.xlu1 %2666  ;;  %v1911_v41 = vpop.permute.xlu0 %1910 }
 0x11f   :  { %v1920_v42 = vsel %vm1916_vm7, %v1909_v34, %v1911_v41  ;;  %v2676_v44 = vsel %vm2089_vm8, %v2665_v35, %v2667_v40 }
 0x120   :  { %3177 = vmatprep.subr.msk.bf16.mxu0 %vm69_vm1, %v1920_v42  ;;  %3219 = vmatmul.mubr.msk.bf16.vlgmr.msra.gmra.mrb[12].mxu1 %vm65_vm3, %v3217_v39  ;;  %v2690_v48 = vsel %vm69_vm1, %v2676_v44, 0 }
 0x121   :  { %1986 = vmatpush1.bf16.msra.mxu0 %v1933_v43  ;;  %2774 = vmatprep.mubr.bf16.mxu1 %v3414_v2 }
 0x122   :  { %v1913_v45 = vpop.permute.xlu1 %1912  ;;  %v2669_v46 = vpop.permute.xlu0 %2668 }
 0x123   :  { %v2677_v47 = vsel %vm2089_vm8, %v2667_v40, %v2669_v46  ;;  %v1921_v49 = vsel %vm1916_vm7, %v1911_v41, %v1913_v45 }
 0x124   :  { %3178 = vmatmul.mubr.msk.bf16.vlgmr.msra.gmra.mrb[16].mxu0 %vm65_vm3, %v3174_v30  ;;  %3220 = vmatprep.subr.msk.bf16.mxu1 %vm69_vm1, %v2677_v47  ;;  %v1939_v53 = vsel %vm69_vm1, %v1921_v49, 0 }
 0x125   :  { %2743 = vmatpush1.bf16.msra.mxu1 %v2690_v48  ;;  %2058 = vmatprep.mubr.bf16.mxu0 %v3414_v2 }
 0x126   :  { %v2671_v50 = vpop.permute.xlu1 %2670  ;;  %v1915_v51 = vpop.permute.xlu0 %1914 }
 0x127   :  { %v1922_v52 = vsel %vm1916_vm7, %v1913_v45, %v1915_v51  ;;  %v2678_v54 = vsel %vm2089_vm8, %v2669_v46, %v2671_v50 }
 0x128   :  { %3179 = vmatprep.subr.msk.bf16.mxu0 %vm69_vm1, %v1922_v52  ;;  %3221 = vmatmul.mubr.msk.bf16.vlgmr.msra.gmra.mrb[16].mxu1 %vm65_vm3, %v3217_v39  ;;  %v2696_v56 = vsel %vm69_vm1, %v2678_v54, 0 }
 0x129   :  { %2027 = vmatpush1.bf16.msra.mxu0 %v1939_v53  ;;  %2815 = vmatprep.mubr.bf16.mxu1 %v3414_v2 }
 0x12a   :  { %v2076_v55 = vpop.permute.xlu1 %2075  ;;  %v2673_v4 = vpop.permute.xlu0 %2672 }
 0x12b   :  { %v2679_v5 = vsel %vm2089_vm8, %v2671_v50, %v2673_v4 }
 0x12c   :  { %3180 = vmatmul.mubr.msk.bf16.vlgmr.msra.gmra.mrb[20].mxu0 %vm65_vm3, %v3174_v30  ;;  %3222 = vmatprep.subr.msk.bf16.mxu1 %vm69_vm1, %v2679_v5  ;;  %v730_v30 = vshrl.u32 %v729_v29, 7 }
 0x12d   :  { %2784 = vmatpush1.bf16.msra.mxu1 %v2696_v56  ;;  %2149 = vmatprep.mubr.bf16.mxu0 %v3414_v2 }
 0x12e   :  { %v2080_v57 = vpop.permute.xlu1 %2079  ;;  %v2078_v58 = vpop.permute.xlu0 %2077  ;;  %v731_v31 = vsub.s32 0, %v730_v30  ;;  %v739_v38 = vsub.s32 2, %v730_v30  ;;  %v743_v42 = vsub.s32 3, %v730_v30 }
 0x12f   :  { %v2090_v3 = vsel %vm2089_vm8, %v2076_v55, %v2078_v58  ;;  %v2091_v59 = vsel %vm2089_vm8, %v2078_v58, %v2080_v57 }
 0x130   :  { %v2100_v60 = vsel %vm69_vm1, %v2090_v3, 0  ;;  %3182 = vmatprep.subr.msk.bf16.mxu0 %vm69_vm1, %v2091_v59  ;;  %3223 = vmatmul.mubr.msk.bf16.vlgmr.msra.gmra.mrb[20].mxu1 %vm65_vm3, %v3217_v39  ;;  %v4025_v33 = vrot.slane %v18_v32, %v731_v31  ;;  %v4035_v50 = vrot.slane %v18_v32, %v739_v38  ;;  %v4038_v55 = vrot.slane %v18_v32, %v743_v42 }
 0x131   :  { %2118 = vmatpush1.bf16.msra.mxu0 %v2100_v60  ;;  %2906 = vmatprep.mubr.bf16.mxu1 %v3414_v2  ;;  %v747_v60 = vsub.s32 4, %v730_v30 }
 0x132   :  { %v2835_v62 = vpop.permute.xlu1 %2834  ;;  %v2833_v8 = vpop.permute.xlu0 %2832 }
 0x133   :  { %v2847_v63 = vsel %vm2846_vm9, %v2833_v8, %v2835_v62 }
 0x134   :  { %3183 = vmatmul.mubr.msk.bf16.vlgmr.msra.gmra.mrb[12].mxu0 %vm65_vm3, %v3181_v61  ;;  %v2857_v9 = vsel %vm69_vm1, %v2847_v63, 0 }
 0x135   :  { %2190 = vmatprep.mubr.bf16.mxu0 %v3414_v2 }
 0x136   :  { %v2082_v0 = vpop.permute.xlu1 %2081  ;;  %v2837_v1 = vpop.permute.xlu0 %2836 }
 0x137   :  { %v2848_v6 = vsel %vm2846_vm9, %v2835_v62, %v2837_v1  ;;  %v2092_v7 = vsel %vm2089_vm8, %v2080_v57, %v2082_v0 }
 0x138   :  { %3225 = vmatprep.subr.msk.bf16.mxu1 %vm69_vm1, %v2848_v6  ;;  %v2106_v10 = vsel %vm69_vm1, %v2092_v7, 0 }
 0x139   :  { %2875 = vmatpush1.bf16.msra.mxu1 %v2857_v9 }
 0x13a   :  { %v2839_v12 = vpop.permute.xlu1 %2838  ;;  %v2084_v13 = vpop.permute.xlu0 %2083 }
 0x13b   :  { %v2093_v15 = vsel %vm2089_vm8, %v2082_v0, %v2084_v13  ;;  %v2849_v14 = vsel %vm2846_vm9, %v2837_v1, %v2839_v12  ;;  %v751_v0 = vsub.s32 5, %v730_v30 }
 0x13c   :  { %3184 = vmatprep.subr.msk.bf16.mxu0 %vm69_vm1, %v2093_v15  ;;  %3226 = vmatmul.mubr.msk.bf16.vlgmr.msra.gmra.mrb[12].mxu1 %vm65_vm3, %v3224_v11  ;;  %v2863_v19 = vsel %vm69_vm1, %v2849_v14, 0  ;;  %v4049_v14 = vrot.slane %v18_v32, %v747_v60 }
 0x13d   :  { %2159 = vmatpush1.bf16.msra.mxu0 %v2106_v10  ;;  %2947 = vmatprep.mubr.bf16.mxu1 %v3414_v2 }
 0x13e   :  { %v2086_v16 = vpop.permute.xlu1 %2085  ;;  %v2841_v17 = vpop.permute.xlu0 %2840 }
 0x13f   :  { %v2850_v18 = vsel %vm2846_vm9, %v2839_v12, %v2841_v17  ;;  %v2094_v20 = vsel %vm2089_vm8, %v2084_v13, %v2086_v16 }
 0x140   :  { %3185 = vmatmul.mubr.msk.bf16.vlgmr.msra.gmra.mrb[16].mxu0 %vm65_vm3, %v3181_v61  ;;  %3227 = vmatprep.subr.msk.bf16.mxu1 %vm69_vm1, %v2850_v18  ;;  %v2112_v24 = vsel %vm69_vm1, %v2094_v20, 0 }
 0x141   :  { %2916 = vmatpush1.bf16.msra.mxu1 %v2863_v19  ;;  %2231 = vmatprep.mubr.bf16.mxu0 %v3414_v2  ;;  %v4052_v19 = vrot.slane %v18_v32, %v751_v0 }
 0x142   :  { %v2843_v21 = vpop.permute.xlu1 %2842  ;;  %v2088_v22 = vpop.permute.xlu0 %2087 }
 0x143   :  { %v2095_v23 = vsel %vm2089_vm8, %v2086_v16, %v2088_v22  ;;  %v2851_v25 = vsel %vm2846_vm9, %v2841_v17, %v2843_v21 }
 0x144   :  { %3186 = vmatprep.subr.msk.bf16.mxu0 %vm69_vm1, %v2095_v23  ;;  %3228 = vmatmul.mubr.msk.bf16.vlgmr.msra.gmra.mrb[16].mxu1 %vm65_vm3, %v3224_v11  ;;  %v2869_v28 = vsel %vm69_vm1, %v2851_v25, 0 }
 0x145   :  { %2200 = vmatpush1.bf16.msra.mxu0 %v2112_v24  ;;  %2988 = vmatprep.mubr.bf16.mxu1 %v3414_v2  ;;  %v735_v2 = vsub.s32 1, %v730_v30 }
 0x146   :  { %v2845_v26 = vpop.permute.xlu0 %2844 }
 0x147   :  { %v2852_v27 = vsel %vm2846_vm9, %v2843_v21, %v2845_v26  ;;  %v4027_v34 = vrot.slane %v18_v32, %v735_v2 }
 0x148   :  { %3187 = vmatmul.mubr.msk.bf16.vlgmr.msra.gmra.mrb[20].mxu0 %vm65_vm3, %v3181_v61  ;;  %3229 = vmatprep.subr.msk.bf16.mxu1 %vm69_vm1, %v2852_v27 }
 0x149   :  { %2957 = vmatpush1.bf16.msra.mxu1 %v2869_v28 }
 0x14c   :  { %3230 = vmatmul.mubr.msk.bf16.vlgmr.msra.gmra.mrb[20].mxu1 %vm65_vm3, %v3224_v11 }
 0x19c   :  { %v606_v35 = vpop.f32.mrb[0].mxu0 }
 0x19d   :  { %v759_v36 = vmul.f32 %v4025_v33, %v606_v35  ;;  %v608_v37 = vpop.f32.mrb[1].mxu0 }
 0x19e   :  { %v3239_v39 = vpack.c.bf16 %v608_v37, %v606_v35  ;;  %v760_v40 = vmul.f32 %v4027_v34, %v608_v37  ;;  %v610_v41 = vpop.f32.mrb[2].mxu0 }
 0x19f   :  { %v774_v43 = vmul.f32 %v759_v36, %v606_v35  ;;  %v611_v44 = vpop.f32.mrb[3].mxu0 }
 0x1a0   :  { %725 = vst [vmem:[%s4132_s3] sm:$0xff] %v3239_v39  ;;  %v765_v45 = vadd.f32 %v760_v40, %v759_v36  ;;  %v775_v46 = vmul.f32 %v760_v40, %v608_v37  ;;  %v1393_v47 = vpop.f32.mrb[0].mxu1 }
 0x1a1   :  { %v1516_v48 = vmul.f32 %v1393_v47, %v4025_v33  ;;  %v1395_v49 = vpop.f32.mrb[1].mxu1 }
 0x1a2   :  { %v780_v51 = vadd.f32 %v775_v46, %v774_v43  ;;  %v3242_v52 = vpack.c.bf16 %v1395_v49, %v1393_v47  ;;  %v1517_v53 = vmul.f32 %v1395_v49, %v4027_v34  ;;  %v1397_v54 = vpop.f32.mrb[2].mxu1 }
 0x1a3   :  { %v1531_v4 = vmul.f32 %v1516_v48, %v1393_v47  ;;  %v1398_v5 = vpop.f32.mrb[3].mxu1 }
 0x1a4   :  { %3148 = vst [vmem:[%s4132_s3 + $0x18] sm:$0xff] %v3242_v52  ;;  %v1522_v56 = vadd.f32 %v1517_v53, %v1516_v48  ;;  %v1532_v57 = vmul.f32 %v1517_v53, %v1395_v49  ;;  %v647_v58 = vpop.f32.mrb[4].mxu0 }
 0x1a5   :  { %v761_v3 = vmul.f32 %v4035_v50, %v647_v58  ;;  %v649_v59 = vpop.f32.mrb[5].mxu0 }
 0x1a6   :  { %v1537_v61 = vadd.f32 %v1532_v57, %v1531_v4  ;;  %v3240_v62 = vpack.c.bf16 %v649_v59, %v647_v58  ;;  %v762_v8 = vmul.f32 %v4038_v55, %v649_v59  ;;  %v651_v63 = vpop.f32.mrb[6].mxu0 }
 0x1a7   :  { %v766_v1 = vadd.f32 %v765_v45, %v761_v3  ;;  %v776_v6 = vmul.f32 %v761_v3, %v647_v58  ;;  %v652_v9 = vpop.f32.mrb[7].mxu0 }
 0x1a8   :  { %726 = vst [vmem:[%s4132_s3 + $0x8] sm:$0xff] %v3240_v62  ;;  %v777_v7 = vmul.f32 %v762_v8, %v649_v59  ;;  %v1434_v11 = vpop.f32.mrb[4].mxu1 }
 0x1a9   :  { %v781_v12 = vadd.f32 %v780_v51, %v776_v6  ;;  %v767_v13 = vadd.f32 %v766_v1, %v762_v8  ;;  %v1518_v15 = vmul.f32 %v1434_v11, %v4035_v50  ;;  %v1436_v10 = vpop.f32.mrb[5].mxu1 }
 0x1aa   :  { %v3243_v16 = vpack.c.bf16 %v1436_v10, %v1434_v11  ;;  %v1519_v17 = vmul.f32 %v1436_v10, %v4038_v55  ;;  %v1438_v18 = vpop.f32.mrb[6].mxu1 }
 0x1ab   :  { %v782_v20 = vadd.f32 %v781_v12, %v777_v7  ;;  %v1523_v21 = vadd.f32 %v1522_v56, %v1518_v15  ;;  %v1533_v22 = vmul.f32 %v1518_v15, %v1434_v11  ;;  %v1439_v23 = vpop.f32.mrb[7].mxu1 }
 0x1ac   :  { %3149 = vst [vmem:[%s4132_s3 + $0x20] sm:$0xff] %v3243_v16  ;;  %v1534_v24 = vmul.f32 %v1519_v17, %v1436_v10  ;;  %v688_v25 = vpop.f32.mrb[8].mxu0 }
 0x1ad   :  { %v1538_v26 = vadd.f32 %v1537_v61, %v1533_v22  ;;  %v1524_v27 = vadd.f32 %v1523_v21, %v1519_v17  ;;  %v763_v28 = vmul.f32 %v4049_v14, %v688_v25  ;;  %v690_v29 = vpop.f32.mrb[9].mxu0 }
 0x1ae   :  { %v3241_v30 = vpack.c.bf16 %v690_v29, %v688_v25  ;;  %v764_v31 = vmul.f32 %v4052_v19, %v690_v29  ;;  %v692_v32 = vpop.f32.mrb[10].mxu0 }
 0x1af   :  { %v1539_v2 = vadd.f32 %v1538_v26, %v1534_v24  ;;  %v768_v35 = vadd.f32 %v767_v13, %v763_v28  ;;  %v778_v36 = vmul.f32 %v763_v28, %v688_v25  ;;  %v693_v37 = vpop.f32.mrb[11].mxu0 }
 0x1b0   :  { %727 = vst [vmem:[%s4132_s3 + $0x10] sm:$0xff] %v3241_v30  ;;  %v779_v38 = vmul.f32 %v764_v31, %v690_v29  ;;  %v1475_v39 = vpop.f32.mrb[8].mxu1 }
 0x1b1   :  { %v783_v40 = vadd.f32 %v782_v20, %v778_v36  ;;  %v1520_v41 = vmul.f32 %v1475_v39, %v4049_v14  ;;  %v1477_v42 = vpop.f32.mrb[9].mxu1  ;;  %v769_v43 = vadd.f32 %v768_v35, %v764_v31 }
 0x1b2   :  { %v3244_v44 = vpack.c.bf16 %v1477_v42, %v1475_v39  ;;  %v1521_v45 = vmul.f32 %v1477_v42, %v4052_v19  ;;  %v1479_v46 = vpop.f32.mrb[10].mxu1 }
 0x1b3   :  { %v1525_v47 = vadd.f32 %v1524_v27, %v1520_v41  ;;  %v1535_v48 = vmul.f32 %v1520_v41, %v1475_v39  ;;  %v1480_v49 = vpop.f32.mrb[11].mxu1  ;;  %770 = vadd.xlane.f32.xlu1 %v769_v43  ;;  %v784_v51 = vadd.f32 %v783_v40, %v779_v38 }
 0x1b4   :  { %3150 = vst [vmem:[%s4132_s3 + $0x28] sm:$0xff] %v3244_v44  ;;  %v1536_v52 = vmul.f32 %v1521_v45, %v1477_v42 }
 0x1b5   :  { %v1540_v53 = vadd.f32 %v1539_v2, %v1535_v48  ;;  %v1526_v54 = vadd.f32 %v1525_v47, %v1521_v45 }
 0x1b7   :  { %1527 = vadd.xlane.f32.xlu0 %v1526_v54  ;;  %v1541_v4 = vadd.f32 %v1540_v53, %v1536_v52 }
 0x1b9   :  { %1542 = vadd.xlane.f32.xlu1 %v1541_v4 }
 0x1bb   :  { %785 = vadd.xlane.f32.xlu0 %v784_v51 }
 0x207   :  { %v2151_v5 = vpop.f32.mrb[12].mxu0 }
 0x208   :  { %v2274_v56 = vmul.f32 %v2151_v5, %v4025_v33  ;;  %v2153_v57 = vpop.f32.mrb[13].mxu0 }
 0x209   :  { %v3245_v58 = vpack.c.bf16 %v2153_v57, %v2151_v5  ;;  %v2275_v3 = vmul.f32 %v2153_v57, %v4027_v34  ;;  %v2155_v59 = vpop.f32.mrb[14].mxu0 }
 0x20a   :  { %v2289_v60 = vmul.f32 %v2274_v56, %v2151_v5  ;;  %v2156_v61 = vpop.f32.mrb[15].mxu0 }
 0x20b   :  { %3191 = vst [vmem:[%s4132_s3 + $0x30] sm:$0xff] %v3245_v58  ;;  %v2280_v62 = vadd.f32 %v2275_v3, %v2274_v56  ;;  %v2290_v8 = vmul.f32 %v2275_v3, %v2153_v57 }
 0x20d   :  { %v2295_v63 = vadd.f32 %v2290_v8, %v2289_v60 }
 0x20f   :  { %v2908_v0 = vpop.f32.mrb[12].mxu1 }
 0x210   :  { %v3031_v1 = vmul.f32 %v2908_v0, %v4025_v33  ;;  %v2910_v6 = vpop.f32.mrb[13].mxu1 }
 0x211   :  { %v3248_v9 = vpack.c.bf16 %v2910_v6, %v2908_v0  ;;  %v3032_v7 = vmul.f32 %v2910_v6, %v4027_v34  ;;  %v2912_v11 = vpop.f32.mrb[14].mxu1 }
 0x212   :  { %v3046_v12 = vmul.f32 %v3031_v1, %v2908_v0  ;;  %v2913_v13 = vpop.f32.mrb[15].mxu1 }
 0x213   :  { %3234 = vst [vmem:[%s4132_s3 + $0x48] sm:$0xff] %v3248_v9  ;;  %v3037_v15 = vadd.f32 %v3032_v7, %v3031_v1  ;;  %v3047_v10 = vmul.f32 %v3032_v7, %v2910_v6  ;;  %v2192_v16 = vpop.f32.mrb[16].mxu0 }
 0x214   :  { %v2276_v17 = vmul.f32 %v2192_v16, %v4035_v50  ;;  %v2194_v18 = vpop.f32.mrb[17].mxu0 }
 0x215   :  { %v3052_v20 = vadd.f32 %v3047_v10, %v3046_v12  ;;  %v3246_v21 = vpack.c.bf16 %v2194_v18, %v2192_v16  ;;  %v2277_v33 = vmul.f32 %v2194_v18, %v4038_v55  ;;  %v2196_v22 = vpop.f32.mrb[18].mxu0 }
 0x216   :  { %v2281_v23 = vadd.f32 %v2280_v62, %v2276_v17  ;;  %v2291_v34 = vmul.f32 %v2276_v17, %v2192_v16  ;;  %v2197_v24 = vpop.f32.mrb[19].mxu0 }
 0x217   :  { %3192 = vst [vmem:[%s4132_s3 + $0x38] sm:$0xff] %v3246_v21  ;;  %v2292_v25 = vmul.f32 %v2277_v33, %v2194_v18  ;;  %v2949_v26 = vpop.f32.mrb[16].mxu1 }
 0x218   :  { %v2296_v27 = vadd.f32 %v2295_v63, %v2291_v34  ;;  %v2282_v28 = vadd.f32 %v2281_v23, %v2277_v33  ;;  %v3033_v29 = vmul.f32 %v2949_v26, %v4035_v50  ;;  %v2951_v30 = vpop.f32.mrb[17].mxu1 }
 0x219   :  { %v3249_v31 = vpack.c.bf16 %v2951_v30, %v2949_v26  ;;  %v3034_v32 = vmul.f32 %v2951_v30, %v4038_v55  ;;  %v2953_v2 = vpop.f32.mrb[18].mxu1 }
 0x21a   :  { %v2297_v35 = vadd.f32 %v2296_v27, %v2292_v25  ;;  %v3038_v36 = vadd.f32 %v3037_v15, %v3033_v29  ;;  %v3048_v37 = vmul.f32 %v3033_v29, %v2949_v26  ;;  %v2954_v38 = vpop.f32.mrb[19].mxu1 }
 0x21b   :  { %3235 = vst [vmem:[%s4132_s3 + $0x50] sm:$0xff] %v3249_v31  ;;  %v3049_v39 = vmul.f32 %v3034_v32, %v2951_v30  ;;  %v2233_v40 = vpop.f32.mrb[20].mxu0 }
 0x21c   :  { %v3053_v41 = vadd.f32 %v3052_v20, %v3048_v37  ;;  %v3039_v42 = vadd.f32 %v3038_v36, %v3034_v32  ;;  %v2278_v43 = vmul.f32 %v2233_v40, %v4049_v14  ;;  %v2235_v50 = vpop.f32.mrb[21].mxu0 }
 0x21d   :  { %v3247_v44 = vpack.c.bf16 %v2235_v50, %v2233_v40  ;;  %v2279_v45 = vmul.f32 %v2235_v50, %v4052_v19  ;;  %v2237_v55 = vpop.f32.mrb[22].mxu0 }
 0x21e   :  { %v3054_v46 = vadd.f32 %v3053_v41, %v3049_v39  ;;  %v2283_v47 = vadd.f32 %v2282_v28, %v2278_v43  ;;  %v2293_v48 = vmul.f32 %v2278_v43, %v2233_v40  ;;  %v2238_v49 = vpop.f32.mrb[23].mxu0 }
 0x21f   :  { %3193 = vst [vmem:[%s4132_s3 + $0x40] sm:$0xff] %v3247_v44  ;;  %v2294_v51 = vmul.f32 %v2279_v45, %v2235_v50  ;;  %v2990_v52 = vpop.f32.mrb[20].mxu1 }
 0x220   :  { %v2298_v53 = vadd.f32 %v2297_v35, %v2293_v48  ;;  %v3035_v54 = vmul.f32 %v2990_v52, %v4049_v14  ;;  %v2992_v4 = vpop.f32.mrb[21].mxu1  ;;  %v2284_v5 = vadd.f32 %v2283_v47, %v2279_v45 }
 0x221   :  { %v3250_v56 = vpack.c.bf16 %v2992_v4, %v2990_v52  ;;  %v3036_v57 = vmul.f32 %v2992_v4, %v4052_v19  ;;  %v2994_v58 = vpop.f32.mrb[22].mxu1 }
 0x222   :  { %v3040_v3 = vadd.f32 %v3039_v42, %v3035_v54  ;;  %v3050_v59 = vmul.f32 %v3035_v54, %v2990_v52  ;;  %v2995_v60 = vpop.f32.mrb[23].mxu1  ;;  %2285 = vadd.xlane.f32.xlu0 %v2284_v5  ;;  %v2299_v61 = vadd.f32 %v2298_v53, %v2294_v51 }
 0x223   :  { %3236 = vst [vmem:[%s4132_s3 + $0x58] sm:$0xff] %v3250_v56  ;;  %v3051_v62 = vmul.f32 %v3036_v57, %v2992_v4 }
 0x224   :  { %v3055_v8 = vadd.f32 %v3054_v46, %v3050_v59  ;;  %2300 = vadd.xlane.f32.xlu1 %v2299_v61  ;;  %v3041_v63 = vadd.f32 %v3040_v3, %v3036_v57 }
 0x226   :  { %3042 = vadd.xlane.f32.xlu0 %v3041_v63  ;;  %v3056_v14 = vadd.f32 %v3055_v8, %v3051_v62 }
 0x228   :  { %3057 = vadd.xlane.f32.xlu1 %v3056_v14 }
 0x240   :  { %v771_v0 = vpop.xlane.xlu1 %770 }
 0x241   :  { %773 = vst.msk [vmem:[%s4133_s4] sm:$0xff] %vm772_vm10, %v771_v0 }
 0x244   :  { %v1528_v19 = vpop.xlane.xlu0 %1527 }
 0x245   :  { %3151 = vst.msk [vmem:[%s4133_s4 + $0x8] sm:$0xff] %vm772_vm10, %v1528_v19 }
 0x246   :  { %v1543_v1 = vpop.xlane.xlu1 %1542 }
 0x247   :  { %3152 = vst.msk [vmem:[%s4134_s5 + $0x8] sm:$0xff] %vm772_vm10, %v1543_v1 }
 0x248   :  { %v786_v6 = vpop.xlane.xlu0 %785 }
 0x249   :  { %787 = vst.msk [vmem:[%s4134_s5] sm:$0xff] %vm772_vm10, %v786_v6 }
 0x2af   :  { %v2286_v9 = vpop.xlane.xlu0 %2285 }
 0x2b0   :  { %3194 = vst.msk [vmem:[%s4133_s4 + $0x10] sm:$0xff] %vm772_vm10, %v2286_v9 }
 0x2b1   :  { %v2301_v7 = vpop.xlane.xlu1 %2300 }
 0x2b2   :  { %3195 = vst.msk [vmem:[%s4134_s5 + $0x10] sm:$0xff] %vm772_vm10, %v2301_v7 }
 0x2b3   :  { %v3043_v11 = vpop.xlane.xlu0 %3042 }
 0x2b4   :  { %3237 = vst.msk [vmem:[%s4133_s4 + $0x18] sm:$0xff] %vm772_vm10, %v3043_v11 }
 0x2b5   :  { %v3058_v12 = vpop.xlane.xlu1 %3057 }
 0x2b6   :  { %3238 = vst.msk [vmem:[%s4134_s5 + $0x18] sm:$0xff] %vm772_vm10, %v3058_v12 }

</bundles_post_ra>
